<compile_context>
chip_gen: v5e
topology: v5e:2x2
jax: 0.10.0
libtpu: 0.0.40
codegen_flags: <defaults>
</compile_context>

<pallas_src>
import jax
import jax.numpy as jnp
from jax import lax
from jax.experimental import pallas as pl
from jax.experimental.pallas import tpu as pltpu


def _round_up(x, m):
    return (x + m - 1) // m * m


def _pick_tz(do, ho_pad, row_cap=256):
    """Largest divisor of `do` with tz*ho_pad <= row_cap, preferring >= 2 z-steps."""
    cap = max(1, row_cap // ho_pad)
    divs = [t for t in range(1, min(do, cap) + 1) if do % t == 0]
    pref = [t for t in divs if do // t >= 2]
    return max(pref) if pref else max(divs)


def _pick_row_tile(rows, lane_bytes, target_bytes=2 * 1024 * 1024, row_cap=1024):
    """Largest multiple-of-8 divisor of `rows` within the row / byte caps."""
    cap = max(8, min(row_cap, rows, (target_bytes // max(lane_bytes, 1)) // 8 * 8))
    best = 8
    t = 8
    while t <= cap:
        if rows % t == 0:
            best = t
        t += 8
    return best


def _deconv_stats_kernel(lhs_ref, wb_hbm_ref, y_ref, s1_ref, s2_ref, wb_vmem_ref):
    """One (n, z-block) grid step: a single fat MXU dot + fused per-n BN stats.

    lhs_ref : (TZ*Ho_pad, K*K*Wp*Cin)  im2row LHS rows for TZ output z-planes
    wb_hbm  : (K*K*Wp*Cin, WoC_pad)    banded flipped weight, resident in HBM
    y_ref   : (TZ*Ho_pad, WoC_pad)     deconv output rows (lane/sublane dense)
    s1/s2   : (1, 1, WoC_pad)          per-batch-sample sum / sum^2 accumulators
    wb_vmem : VMEM scratch holding the banded weight (loaded once per n)
    """
    @pl.when(pl.program_id(1) == 0)
    def _init():
        # Single-buffered constant operand: one DMA per batch sample instead of a
        # double-buffered pipelined input that never changes.
        pltpu.sync_copy(wb_hbm_ref, wb_vmem_ref)
        s1_ref[...] = jnp.zeros_like(s1_ref)
        s2_ref[...] = jnp.zeros_like(s2_ref)

    acc = jnp.dot(lhs_ref[...], wb_vmem_ref[...],
                  preferred_element_type=jnp.float32)      # (TZ*Ho_pad, WoC_pad)
    y_ref[...] = acc
    s1_ref[0] += jnp.sum(acc, axis=0, keepdims=True)
    s2_ref[0] += jnp.sum(acc * acc, axis=0, keepdims=True)


def _bn_relu_kernel(y_ref, scale_ref, shift_ref, o_ref):
    """Tiled normalize + ReLU over a lane-dense 2-D slab."""
    o_ref[...] = jnp.maximum(y_ref[...] * scale_ref[...] + shift_ref[...], 0.0)


def _banded_weight(w_t, Wp, Wo):
    """ConvTranspose3d weight (Cin, Cout, K, K, K) -> banded matrix (K*K*Wp*Cin, Wo*Cout).

    Row index = ((ky*K + kz)*Wp + xi)*Cin + ci ,  Col index = xo*Cout + co
    Entry     = w_t[ci, co, K-1-kz, K-1-ky, K-1-(xi-xo)]  if 0 <= xi-xo < K else 0.
    """
    Cin, Cout, K = w_t.shape[0], w_t.shape[1], w_t.shape[2]
    wf = jnp.transpose(jnp.flip(w_t, (2, 3, 4)), (2, 3, 4, 0, 1)).astype(jnp.float32)
    xi = jnp.arange(Wp)[:, None]
    xo = jnp.arange(Wo)[None, :]
    kx = xi - xo                                            # (Wp, Wo)
    valid = (kx >= 0) & (kx < K)
    wfk = wf[:, :, jnp.clip(kx, 0, K - 1)]                  # (kz, ky, Wp, Wo, Cin, Cout)
    wfk = jnp.where(valid[None, None, :, :, None, None], wfk, 0.0)
    wb = jnp.transpose(wfk, (1, 0, 2, 4, 3, 5))             # (ky, kz, xi, ci, xo, co)
    return wb.reshape(K * K * Wp * Cin, Wo * Cout)


def deconv3d_unit(x_ncdhw, w_t, gamma, beta, *, eps=1e-5):
    """Forward of Deconv3dUnit (defaults: kernel_size=3, stride=1, bn=True, relu=True).

    x_ncdhw : (N, Cin, D, H, W)        PyTorch-layout input
    w_t     : (Cin, Cout, K, K, K)     PyTorch ConvTranspose3d weight
    gamma, beta : (Cout,)              BatchNorm3d affine parameters
    """
    N, Cin, D, H, W = x_ncdhw.shape
    Cout, K = w_t.shape[1], w_t.shape[-1]
    pad = K - 1
    Do, Ho, Wo = D + pad, H + pad, W + pad
    Ho_pad = _round_up(Ho, 8)             # sublane-dense output rows
    Dp = D + 2 * pad
    Hp = Ho_pad + pad                     # enough input rows for yo in [0, Ho_pad)
    Wp = W + 2 * pad
    WpC = Wp * Cin
    KKWpC = K * K * WpC
    WoC = Wo * Cout
    WoC_pad = _round_up(WoC, 128)         # lane-dense output columns

    # ---- host-side layout plumbing (cheap XLA data movement, no compute) -----
    # NCDHW -> N,Dp,Hp,(Wp*Cin), zero-padded; then unfold (ky, kz) into the lane
    # axis so the Pallas kernel is a pure tiled matmul with no in-kernel concats.
    x = jnp.transpose(x_ncdhw, (0, 2, 3, 4, 1)).astype(jnp.float32)
    xp = jnp.pad(x, ((0, 0), (pad, pad), (pad, pad + (Ho_pad - Ho)),
                     (pad, pad), (0, 0)))
    xp = xp.reshape(N, Dp, Hp, WpC)
    # Lane order must match _banded_weight rows: ((ky*K + kz)*Wp + xi)*Cin + ci.
    xrows = jnp.concatenate(
        [xp[:, kz:kz + Do, ky:ky + Ho_pad, :] for ky in range(K) for kz in range(K)],
        axis=-1)                                           # (N, Do, Ho_pad, K*K*WpC)
    lhs = xrows.reshape(N * Do * Ho_pad, KKWpC)

    wb = _banded_weight(w_t, Wp, Wo)                        # (K*K*WpC, WoC)
    wb = jnp.pad(wb, ((0, 0), (0, WoC_pad - WoC)))          # lane-dense columns

    TZ = _pick_tz(Do, Ho_pad)             # output z-planes per grid step
    ZB = Do // TZ
    TM = TZ * Ho_pad                      # matmul rows per step (multiple of 8)
    R = N * Do * Ho_pad

    # ---- pass 1: deconv (fat matmul) + fused per-n BN statistics -------------
    y2, s1, s2 = pl.pallas_call(
        _deconv_stats_kernel,
        grid=(N, ZB),
        in_specs=[
            pl.BlockSpec((TM, KKWpC), lambda n, z: (n * ZB + z, 0)),
            pl.BlockSpec(memory_space=pl.ANY),      # banded weight stays in HBM
        ],
        out_specs=[
            pl.BlockSpec((TM, WoC_pad), lambda n, z: (n * ZB + z, 0)),
            pl.BlockSpec((1, 1, WoC_pad), lambda n, z: (n, 0, 0)),  # per-n stats
            pl.BlockSpec((1, 1, WoC_pad), lambda n, z: (n, 0, 0)),
        ],
        out_shape=[
            jax.ShapeDtypeStruct((R, WoC_pad), jnp.float32),
            jax.ShapeDtypeStruct((N, 1, WoC_pad), jnp.float32),
            jax.ShapeDtypeStruct((N, 1, WoC_pad), jnp.float32),
        ],
        scratch_shapes=[pltpu.VMEM((KKWpC, WoC_pad), jnp.float32)],
        compiler_params=pltpu.CompilerParams(
            # Stats are per-n, so N can be megacore-split; z is the accumulation axis.
            dimension_semantics=("parallel", "arbitrary"),
            vmem_limit_bytes=32 * 1024 * 1024),
    )(lhs, wb)

    # ---- tiny BN statistics epilogue: parallel-Welford combine over (n, xo) --
    cnt_g = float(Do * Ho)                                   # samples per (n, xo) group
    cnt_t = float(N * Wo * Do * Ho)
    s1g = s1[:, 0, :WoC].reshape(N * Wo, Cout)
    s2g = s2[:, 0, :WoC].reshape(N * Wo, Cout)
    mean_g = s1g / cnt_g
    m2_g = jnp.maximum(s2g - s1g * mean_g, 0.0)
    mean = jnp.sum(s1g, axis=0) / cnt_t
    m2 = jnp.sum(m2_g, axis=0) + cnt_g * jnp.sum((mean_g - mean) ** 2, axis=0)
    var = m2 / cnt_t                                         # biased batch variance
    scale_c = gamma.astype(jnp.float32) * lax.rsqrt(var + eps)
    shift_c = beta.astype(jnp.float32) - mean * scale_c
    scale = jnp.pad(jnp.tile(scale_c, Wo), (0, WoC_pad - WoC)).reshape(1, WoC_pad)
    shift = jnp.pad(jnp.tile(shift_c, Wo), (0, WoC_pad - WoC)).reshape(1, WoC_pad)

    # ---- pass 2: normalize + ReLU over large lane-dense 2-D tiles -------------
    TR = _pick_row_tile(R, WoC_pad * 4)
    out2 = pl.pallas_call(
        _bn_relu_kernel,
        grid=(R // TR,),
        in_specs=[
            pl.BlockSpec((TR, WoC_pad), lambda r: (r, 0)),
            pl.BlockSpec((1, WoC_pad), lambda r: (0, 0)),
            pl.BlockSpec((1, WoC_pad), lambda r: (0, 0)),
        ],
        out_specs=pl.BlockSpec((TR, WoC_pad), lambda r: (r, 0)),
        out_shape=jax.ShapeDtypeStruct((R, WoC_pad), jnp.float32),
        compiler_params=pltpu.CompilerParams(
            dimension_semantics=("parallel",),
            vmem_limit_bytes=32 * 1024 * 1024),
    )(y2, scale, shift)

    # ---- strip padding, back to NCDHW -----------------------------------------
    # TODO(synk): if the surrounding graph can stay channels-last (N,D,H,W,C),
    # drop this transpose (and the leading one) to save a full HBM round trip.
    out = out2[:, :WoC].reshape(N, Do, Ho_pad, Wo, Cout)[:, :, :Ho]
    return jnp.transpose(out, (0, 4, 1, 2, 3))               # -> NCDHW


def _reference(x_ncdhw, w_t, gamma, beta, eps=1e-5):
    """Pure-JAX reference (different code path: lax conv + two-pass BN)."""
    K = w_t.shape[-1]
    w_conv = jnp.transpose(jnp.flip(w_t, axis=(2, 3, 4)), (1, 0, 2, 3, 4))  # OIDHW
    y = lax.conv_general_dilated(
        x_ncdhw, w_conv, window_strides=(1, 1, 1),
        padding=[(K - 1, K - 1)] * 3,
        dimension_numbers=("NCDHW", "OIDHW", "NCDHW"))
    mean = jnp.mean(y, axis=(0, 2, 3, 4), keepdims=True)
    var = jnp.mean((y - mean) ** 2, axis=(0, 2, 3, 4), keepdims=True)
    yhat = (y - mean) * lax.rsqrt(var + eps)
    out = gamma.reshape(1, -1, 1, 1, 1) * yhat + beta.reshape(1, -1, 1, 1, 1)
    return jnp.maximum(out, 0.0)


if __name__ == "__main__":
    key = jax.random.PRNGKey(0)
    k_x, k_w, k_g, k_b = jax.random.split(key, 4)

    N, Cin, Cout, D, H, W, K = 2, 4, 8, 8, 8, 8, 3
    x = jax.random.normal(k_x, (N, Cin, D, H, W), dtype=jnp.float32)
    w_t = 0.1 * jax.random.normal(k_w, (Cin, Cout, K, K, K), dtype=jnp.float32)
    gamma = 1.0 + 0.1 * jax.random.normal(k_g, (Cout,), dtype=jnp.float32)
    beta = 0.1 * jax.random.normal(k_b, (Cout,), dtype=jnp.float32)

    out = jax.jit(deconv3d_unit)(x, w_t, gamma, beta)
    out = jax.block_until_ready(out)

    assert out.shape == (N, Cout, D + K - 1, H + K - 1, W + K - 1), out.shape

    ref = _reference(x, w_t, gamma, beta)
    if not jnp.allclose(out, ref, rtol=1e-4, atol=2e-4):
        raise AssertionError(
            f"mismatch vs reference, max abs err = {jnp.max(jnp.abs(out - ref))}")

    print("KERNEL_OK")
</pallas_src>

<mosaic_0001>
module attributes {stable_mosaic.version = 11 : i64} {
  func.func @_deconv_stats_kernel(%arg0: i32, %arg1: i32, %arg2: memref<80x432xf32, #tpu.memory_space<vmem>>, %arg3: memref<432x128xf32, #tpu.memory_space<any>>, %arg4: memref<80x128xf32, #tpu.memory_space<vmem>>, %arg5: memref<1x1x128xf32, #tpu.memory_space<vmem>>, %arg6: memref<1x1x128xf32, #tpu.memory_space<vmem>>, %arg7: memref<432x128xf32, #tpu.memory_space<vmem>>) attributes {dimension_semantics = [#tpu.dimension_semantics<parallel>, #tpu.dimension_semantics<arbitrary>], iteration_bounds = array<i64: 2, 2>, scalar_prefetch = 0 : i64, scratch_operands = 1 : i64, tpu.core_type = #tpu.core_type<tc>, window_params = [{transform_indices = @transform_0, window_bounds = array<i64: 80, 432>}, {}, {transform_indices = @transform_2, window_bounds = array<i64: 80, 128>}, {transform_indices = @transform_3, window_bounds = array<i64: 1, 1, 128>}, {transform_indices = @transform_4, window_bounds = array<i64: 1, 1, 128>}]} {
    %c0_i32 = arith.constant 0 : i32
    %0 = arith.cmpi eq, %arg1, %c0_i32 : i32
    %1 = arith.extui %0 : i1 to i32
    %c0_i32_0 = arith.constant 0 : i32
    %2 = arith.cmpi ne, %1, %c0_i32_0 : i32
    scf.if %2 {
      "tpu.region"() ({
        %28 = tpu.sem_alloc : memref<!tpu.dma_semaphore, #tpu.memory_space<semaphore_mem>>
        tpu.enqueue_dma source(%arg3 : memref<432x128xf32, #tpu.memory_space<any>>) target(%arg7 : memref<432x128xf32, #tpu.memory_space<vmem>>) target_semaphore(%28 : memref<!tpu.dma_semaphore, #tpu.memory_space<semaphore_mem>>)
        tpu.wait_dma2 semaphore(%28 : memref<!tpu.dma_semaphore, #tpu.memory_space<semaphore_mem>>) src(%arg3 : memref<432x128xf32, #tpu.memory_space<any>>) dst(%arg7 : memref<432x128xf32, #tpu.memory_space<vmem>>)
        tpu.yield
      }) : () -> ()
      %cst_20 = arith.constant 0.000000e+00 : f32
      %24 = vector.broadcast %cst_20 : f32 to vector<1x1x128xf32>
      %c0_21 = arith.constant 0 : index
      %c0_22 = arith.constant 0 : index
      %c0_23 = arith.constant 0 : index
      %25 = vector.load %arg5[%c0_21, %c0_22, %c0_23] : memref<1x1x128xf32, #tpu.memory_space<vmem>>, vector<1x1x128xf32>
      tpu.vector_store %arg5[%c0_21, %c0_22, %c0_23], %24 {strides = array<i32>} : memref<1x1x128xf32, #tpu.memory_space<vmem>>, vector<1x1x128xf32>,
      %cst_24 = arith.constant 0.000000e+00 : f32
      %26 = vector.broadcast %cst_24 : f32 to vector<1x1x128xf32>
      %c0_25 = arith.constant 0 : index
      %c0_26 = arith.constant 0 : index
      %c0_27 = arith.constant 0 : index
      %27 = vector.load %arg6[%c0_25, %c0_26, %c0_27] : memref<1x1x128xf32, #tpu.memory_space<vmem>>, vector<1x1x128xf32>
      tpu.vector_store %arg6[%c0_25, %c0_26, %c0_27], %26 {strides = array<i32>} : memref<1x1x128xf32, #tpu.memory_space<vmem>>, vector<1x1x128xf32>,
    } else {
    }
    %c0 = arith.constant 0 : index
    %c0_1 = arith.constant 0 : index
    %3 = vector.load %arg2[%c0, %c0_1] : memref<80x432xf32, #tpu.memory_space<vmem>>, vector<80x432xf32>
    %c0_2 = arith.constant 0 : index
    %c0_3 = arith.constant 0 : index
    %4 = vector.load %arg7[%c0_2, %c0_3] : memref<432x128xf32, #tpu.memory_space<vmem>>, vector<432x128xf32>
    %cst = arith.constant dense<0.000000e+00> : vector<80x128xf32>
    %5 = tpu.matmul %3, %4, %cst {dimension_numbers = #tpu.dot_dimension_numbers<[1], [0], [0], [1], [0, 0, 1, 1], [], []>} : vector<80x432xf32>, vector<432x128xf32>, vector<80x128xf32> -> vector<80x128xf32>
    %c0_4 = arith.constant 0 : index
    %c0_5 = arith.constant 0 : index
    %6 = vector.load %arg4[%c0_4, %c0_5] : memref<80x128xf32, #tpu.memory_space<vmem>>, vector<80x128xf32>
    tpu.vector_store %arg4[%c0_4, %c0_5], %5 {strides = array<i32>} : memref<80x128xf32, #tpu.memory_space<vmem>>, vector<80x128xf32>,
    %c0_6 = arith.constant 0 : index
    %c0_7 = arith.constant 0 : index
    %c0_8 = arith.constant 0 : index
    %7 = vector.load %arg5[%c0_6, %c0_7, %c0_8] : memref<1x1x128xf32, #tpu.memory_space<vmem>>, vector<1x1x128xf32>
    %8 = vector.shape_cast %7 : vector<1x1x128xf32> to vector<1x128xf32>
    %cst_9 = arith.constant dense<0.000000e+00> : vector<128xf32>
    %9 = vector.multi_reduction <add>, %5, %cst_9 [0] : vector<80x128xf32> to vector<128xf32>
    %10 = vector.shape_cast %9 : vector<128xf32> to vector<1x128xf32>
    %11 = arith.addf %8, %10 : vector<1x128xf32>
    %c0_10 = arith.constant 0 : index
    %c0_11 = arith.constant 0 : index
    %c0_12 = arith.constant 0 : index
    %12 = vector.load %arg5[%c0_10, %c0_11, %c0_12] : memref<1x1x128xf32, #tpu.memory_space<vmem>>, vector<1x1x128xf32>
    %13 = vector.shape_cast %12 : vector<1x1x128xf32> to vector<1x128xf32>
    %14 = vector.shape_cast %11 : vector<1x128xf32> to vector<1x1x128xf32>
    tpu.vector_store %arg5[%c0_10, %c0_11, %c0_12], %14 {strides = array<i32>} : memref<1x1x128xf32, #tpu.memory_space<vmem>>, vector<1x1x128xf32>,
    %c0_13 = arith.constant 0 : index
    %c0_14 = arith.constant 0 : index
    %c0_15 = arith.constant 0 : index
    %15 = vector.load %arg6[%c0_13, %c0_14, %c0_15] : memref<1x1x128xf32, #tpu.memory_space<vmem>>, vector<1x1x128xf32>
    %16 = vector.shape_cast %15 : vector<1x1x128xf32> to vector<1x128xf32>
    %17 = arith.mulf %5, %5 : vector<80x128xf32>
    %cst_16 = arith.constant dense<0.000000e+00> : vector<128xf32>
    %18 = vector.multi_reduction <add>, %17, %cst_16 [0] : vector<80x128xf32> to vector<128xf32>
    %19 = vector.shape_cast %18 : vector<128xf32> to vector<1x128xf32>
    %20 = arith.addf %16, %19 : vector<1x128xf32>
    %c0_17 = arith.constant 0 : index
    %c0_18 = arith.constant 0 : index
    %c0_19 = arith.constant 0 : index
    %21 = vector.load %arg6[%c0_17, %c0_18, %c0_19] : memref<1x1x128xf32, #tpu.memory_space<vmem>>, vector<1x1x128xf32>
    %22 = vector.shape_cast %21 : vector<1x1x128xf32> to vector<1x128xf32>
    %23 = vector.shape_cast %20 : vector<1x128xf32> to vector<1x1x128xf32>
    tpu.vector_store %arg6[%c0_17, %c0_18, %c0_19], %23 {strides = array<i32>} : memref<1x1x128xf32, #tpu.memory_space<vmem>>, vector<1x1x128xf32>,
    return
  }
  func.func @transform_0(%arg0: i32, %arg1: i32) -> (i32, i32) {
    %c2_i32 = arith.constant 2 : i32
    %0 = arith.muli %arg0, %c2_i32 : i32
    %1 = arith.addi %0, %arg1 : i32
    %c0_i32 = arith.constant 0 : i32
    %c0_i32_0 = arith.constant 0 : i32
    return %1, %c0_i32 : i32, i32
  }
  func.func @transform_2(%arg0: i32, %arg1: i32) -> (i32, i32) {
    %c2_i32 = arith.constant 2 : i32
    %0 = arith.muli %arg0, %c2_i32 : i32
    %1 = arith.addi %0, %arg1 : i32
    %c0_i32 = arith.constant 0 : i32
    %c0_i32_0 = arith.constant 0 : i32
    return %1, %c0_i32 : i32, i32
  }
  func.func @transform_3(%arg0: i32, %arg1: i32) -> (i32, i32, i32) {
    %c0_i32 = arith.constant 0 : i32
    %c0_i32_0 = arith.constant 0 : i32
    %c0_i32_1 = arith.constant 0 : i32
    return %arg0, %c0_i32, %c0_i32_0 : i32, i32, i32
  }
  func.func @transform_4(%arg0: i32, %arg1: i32) -> (i32, i32, i32) {
    %c0_i32 = arith.constant 0 : i32
    %c0_i32_0 = arith.constant 0 : i32
    %c0_i32_1 = arith.constant 0 : i32
    return %arg0, %c0_i32, %c0_i32_0 : i32, i32, i32
  }
}

module attributes {stable_mosaic.version = 11 : i64} {
  func.func @_bn_relu_kernel(%arg0: i32, %arg1: memref<320x128xf32, #tpu.memory_space<vmem>>, %arg2: memref<1x128xf32, #tpu.memory_space<vmem>>, %arg3: memref<1x128xf32, #tpu.memory_space<vmem>>, %arg4: memref<320x128xf32, #tpu.memory_space<vmem>>) attributes {dimension_semantics = [#tpu.dimension_semantics<parallel>], iteration_bounds = array<i64: 1>, scalar_prefetch = 0 : i64, scratch_operands = 0 : i64, tpu.core_type = #tpu.core_type<tc>, window_params = [{transform_indices = @transform_0, window_bounds = array<i64: 320, 128>}, {pipeline_mode = #tpu.pipeline_mode<synchronous>, transform_indices = @transform_1, window_bounds = array<i64: 1, 128>}, {pipeline_mode = #tpu.pipeline_mode<synchronous>, transform_indices = @transform_2, window_bounds = array<i64: 1, 128>}, {transform_indices = @transform_3, window_bounds = array<i64: 320, 128>}]} {
    %c0 = arith.constant 0 : index
    %c0_0 = arith.constant 0 : index
    %0 = vector.load %arg1[%c0, %c0_0] : memref<320x128xf32, #tpu.memory_space<vmem>>, vector<320x128xf32>
    %c0_1 = arith.constant 0 : index
    %c0_2 = arith.constant 0 : index
    %1 = vector.load %arg2[%c0_1, %c0_2] : memref<1x128xf32, #tpu.memory_space<vmem>>, vector<1x128xf32>
    %2 = vector.broadcast %1 : vector<1x128xf32> to vector<320x128xf32>
    %3 = arith.mulf %0, %2 : vector<320x128xf32>
    %c0_3 = arith.constant 0 : index
    %c0_4 = arith.constant 0 : index
    %4 = vector.load %arg3[%c0_3, %c0_4] : memref<1x128xf32, #tpu.memory_space<vmem>>, vector<1x128xf32>
    %5 = vector.broadcast %4 : vector<1x128xf32> to vector<320x128xf32>
    %6 = arith.addf %3, %5 : vector<320x128xf32>
    %cst = arith.constant 0.000000e+00 : f32
    %7 = vector.broadcast %cst : f32 to vector<320x128xf32>
    %8 = arith.maximumf %6, %7 : vector<320x128xf32>
    %c0_5 = arith.constant 0 : index
    %c0_6 = arith.constant 0 : index
    %9 = vector.load %arg4[%c0_5, %c0_6] : memref<320x128xf32, #tpu.memory_space<vmem>>, vector<320x128xf32>
    tpu.vector_store %arg4[%c0_5, %c0_6], %8 {strides = array<i32>} : memref<320x128xf32, #tpu.memory_space<vmem>>, vector<320x128xf32>,
    return
  }
  func.func @transform_0(%arg0: i32) -> (i32, i32) {
    %c0_i32 = arith.constant 0 : i32
    %c0_i32_0 = arith.constant 0 : i32
    return %arg0, %c0_i32 : i32, i32
  }
  func.func @transform_1(%arg0: i32) -> (i32, i32) {
    %c0_i32 = arith.constant 0 : i32
    %c0_i32_0 = arith.constant 0 : i32
    %c0_i32_1 = arith.constant 0 : i32
    return %c0_i32, %c0_i32_0 : i32, i32
  }
  func.func @transform_2(%arg0: i32) -> (i32, i32) {
    %c0_i32 = arith.constant 0 : i32
    %c0_i32_0 = arith.constant 0 : i32
    %c0_i32_1 = arith.constant 0 : i32
    return %c0_i32, %c0_i32_0 : i32, i32
  }
  func.func @transform_3(%arg0: i32) -> (i32, i32) {
    %c0_i32 = arith.constant 0 : i32
    %c0_i32_0 = arith.constant 0 : i32
    return %arg0, %c0_i32 : i32, i32
  }
}

</mosaic_0001>

<bundles_post_ra>
// kernel: squeeze.2
= control target key start
LH: loop header
LB: loop body
LE: loop exit
PB: predicated region body
PF: predicated region fallthrough
CT: control target
= control target key end

     0   :  { %s82_s8 = smov 120   ;;  %s83_s9 = smov 88   ;;  %vm7_vm0 = vcmask 64512   ;;  %s143_s0 = inlined_call_operand.vmem [shape: f32[2,80], index: 0, kind: input, shape index: {}]   ;;  %s144_s1 = inlined_call_operand.vmem [shape: f32[20,8], index: 1, kind: output, shape index: {}]  }
   0x1   :  { %v4_v0 = vld [vmem:[%s143_s0] sm:$0x3]  ;;  %s81_s0 = smov 104   ;;  %s84_s10 = smov 96  }
   0x2   :  { %5 = vst [vmem:[#allocation0] sm:$0x3] %v4_v0  ;;  %s85_s11 = smov 112   ;;  %s86_s12 = smov 80  }
   0x3   :  { %s87_s13 = smov 64   ;;  %s88_s14 = smov 72  }
   0x4   :  { %s89_s15 = smov 56  }
   0x9   :  { %v21_v1 = vld [vmem:[#allocation0] sm:$0x3]  }
   0xa   :  { %v9_v2 = vld [vmem:[#allocation0] sm:$0x3]   ;;  %22 = vrot.lane.b32.xlu1 %v21_v1, %s81_s0 }
   0xb   :  { %10 = vrot.lane.b32.xlu0 %v9_v2, %s82_s8  ;;  %v33_v3 = vld [vmem:[#allocation0] sm:$0x3]  }
   0xc   :  { %34 = vrot.lane.b32.xlu2 %v33_v3, %s83_s9  ;;  %v27_v4 = vld [vmem:[#allocation0] sm:$0x3]  }
   0xd   :  { %v15_v5 = vld [vmem:[#allocation0] sm:$0x3]  }
   0xe   :  { %v39_v6 = vld [vmem:[#allocation0] sm:$0x3]  }
   0xf   :  { %v51_v7 = vld [vmem:[#allocation0] sm:$0x3]  }
  0x10   :  { %v45_v8 = vld [vmem:[#allocation0] sm:$0x3]  }
  0x11   :  { %v57_v9 = vld [vmem:[#allocation0] sm:$0x3]  }
  0x12   :  { %28 = vrot.lane.b32.xlu1 %v27_v4, %s84_s10  ;;  %v6_v11 = vld [vmem:[#allocation0] sm:$0x3]  }
  0x13   :  { %16 = vrot.lane.b32.xlu0 %v15_v5, %s85_s11  ;;  %8 = vst.msk [vmem:[%s144_s1] ss:$10 sm:$0x3] %vm7_vm0, %v6_v11  }
  0x14   :  { %40 = vrot.lane.b32.xlu2 %v39_v6, %s86_s12 }
  0x1a   :  { %52 = vrot.lane.b32.xlu1 %v51_v7, %s87_s13 }
  0x1b   :  { %46 = vrot.lane.b32.xlu0 %v45_v8, %s88_s14 }
  0x1c   :  { %58 = vrot.lane.b32.xlu2 %v57_v9, %s89_s15 }
  0x66   :  { %v35_v10 = vpop.permute.xlu2 %34  }
  0x67   :  { %67 = vst.msk [vmem:[%s144_s1 + $0x5] ss:$10 sm:$0x3] %vm7_vm0, %v35_v10  }
  0x6e   :  { %v41_v12 = vpop.permute.xlu2 %40  }
  0x6f   :  { %68 = vst.msk [vmem:[%s144_s1 + $0x6] ss:$10 sm:$0x3] %vm7_vm0, %v41_v12  }
  0x76   :  { %v59_v13 = vpop.permute.xlu2 %58  }
  0x77   :  { %71 = vst.msk [vmem:[%s144_s1 + $0x9] ss:$10 sm:$0x3] %vm7_vm0, %v59_v13  }
  0x7c   :  { %v23_v14 = vpop.permute.xlu1 %22  }
  0x7d   :  { %v11_v15 = vpop.permute.xlu0 %10   ;;  %65 = vst.msk [vmem:[%s144_s1 + $0x3] ss:$10 sm:$0x3] %vm7_vm0, %v23_v14  }
  0x7e   :  { %63 = vst.msk [vmem:[%s144_s1 + $0x1] ss:$10 sm:$0x3] %vm7_vm0, %v11_v15  }
  0x84   :  { %v29_v16 = vpop.permute.xlu1 %28  }
  0x85   :  { %v17_v17 = vpop.permute.xlu0 %16   ;;  %66 = vst.msk [vmem:[%s144_s1 + $0x4] ss:$10 sm:$0x3] %vm7_vm0, %v29_v16  }
  0x86   :  { %64 = vst.msk [vmem:[%s144_s1 + $0x2] ss:$10 sm:$0x3] %vm7_vm0, %v17_v17  }
  0x8c   :  { %v53_v18 = vpop.permute.xlu1 %52  }
  0x8d   :  { %v47_v19 = vpop.permute.xlu0 %46   ;;  %70 = vst.msk [vmem:[%s144_s1 + $0x8] ss:$10 sm:$0x3] %vm7_vm0, %v53_v18  }
  0x8e   :  { %69 = vst.msk [vmem:[%s144_s1 + $0x7] ss:$10 sm:$0x3] %vm7_vm0, %v47_v19  }

// kernel: deconv3d_unit.2
= control target key start
LH: loop header
LB: loop body
LE: loop exit
PB: predicated region body
PF: predicated region fallthrough
CT: control target
= control target key end

     0   :  { %s998_s15 = smov 0   ;;  %s1000_s16 = smov 0   ;;  %s1295_s0 = inlined_call_operand.vmem [shape: f32[320,432], index: 0, kind: input, shape index: {}]   ;;  %s1296_s1 = inlined_call_operand.vmem [shape: f32[432,128], index: 1, kind: input, shape index: {}]   ;;  %s1297_s2 = inlined_call_operand.vmem [shape: f32[320,128], index: 2, kind: output, shape index: {0}]   ;;  %s1298_s3 = inlined_call_operand.vmem [shape: f32[2,1,128], index: 3, kind: output, shape index: {1}]   ;;  %s1299_s4 = inlined_call_operand.vmem [shape: f32[2,1,128], index: 4, kind: output, shape index: {2}]  }
   0x1   :  { %s1002_s17 = smov 0   ;;  %s1004_s18 = smov 0  }
   0x2   :  { %s1006_s19 = smov 0  }
   0x3 LB: > { %s24_s20 = sadd.s32 1, %s962_s17  ;;  %s27_s21 = sadd.s32 1, %s966_s18  ;;  %s970_s19 = sphi %s1006_s19, %s15_s19   ;;  %s966_s18 = sphi %s1004_s18, %s1303_s18   ;;  %s962_s17 = sphi %s1002_s17, %s1302_s17   ;;  %s958_s16 = sphi %s1000_s16, %s1301_s16   ;;  %s954_s15 = sphi %s998_s15, %s1300_s15  }
   0x4   : > { %p25_p0 = scmp.ge.s32.totalorder %s24_s20, 2  ;;  %p869_p1 = scmp.ge.s32.totalorder %s970_s19, 1 }
   0x5   : > { %p169_p2 = scmp.lt.s32.totalorder %s970_s19, 5 }
   0x6   : > { %s1305_s20 = smov (%p25_p0, %s24_s20), 0  ;;  %s1307_s21 = smov (!%p25_p0, %s27_s21), %s966_s18 }
   0x7   : > { %p170_p3 = pnand %p869_p1, %p169_p2  ;;  %p29_p4 = scmp.ge.s32.totalorder %s1307_s21, 2 }
   0x8   : > { %s870_s22 = sshll.u32 (!%p170_p3), %s958_s16, 1  ;;  %p225_p5 = scmp.lt.s32.totalorder (!%p170_p3), %s958_s16, 1 }
   0x9   : > { %s1309_s21 = smov (%p29_p4, %s1307_s21), 0  ;;  %173 = sbr.rel (%p170_p3) target bundleno = 338 (0x152), region = 24 }
   0xa   : > { %s205_s23 = sadd.s32 (!%p170_p3), %s954_s15, %s870_s22  ;;  %p875_p7 = scmp.ne.s32.totalorder (!%p170_p3), %s954_s15, 0 }
   0xb   : > { %s206_s24 = smul.u32 (!%p170_p3), 10, %s205_s23 }
   0xd   : > { %p207_p6 = scmp.lt.s32.totalorder (!%p170_p3), %s206_s24, 39 }
   0xe   : > { %s1311_s16 = smov (!%p225_p5, %s958_s16), 1  ;;  %234 = sbr.rel (%p875_p7) target bundleno = 79 (0x4f), region = 28 }
   0xf   : > { %s1034_s27 = scalar_lea.vmem %s1298_s3, %s1311_s16  ;;  %s1039_s30 = scalar_lea.vmem %s1299_s4, %s1311_s16 }
  0x10   : > { %s1313_s24 = smov (!%p207_p6, %s206_s24), 39 }
  0x11   : > { %s888_s5 = sshll.u32 %s1313_s24, 5  ;;  %s874_s6 = sshll.u32 %s1313_s24, 3 }
  0x12   : > { %s1044_s9 = scalar_lea.vmem %s1295_s0, %s888_s5  ;;  %s1049_s12 = scalar_lea.vmem %s1297_s2, %s874_s6 }
  0x13   : > { %v245_v0 = vld [vmem:[%s1296_s1] sm:$0xff]  ;;  %v247_v1 = vld [vmem:[%s1296_s1 + $0x8] sm:$0xff]  ;;  %v249_v2 = vld [vmem:[%s1296_s1 + $0x10] sm:$0xff] }
  0x14   : > { %246 = vst [vmem:[#allocation2 + $0xb0] sm:$0xff] %v245_v0  ;;  %v251_v3 = vld [vmem:[%s1296_s1 + $0x18] sm:$0xff]  ;;  %v253_v4 = vld [vmem:[%s1296_s1 + $0x20] sm:$0xff]  ;;  %v255_v5 = vld [vmem:[%s1296_s1 + $0x28] sm:$0xff] }
  0x15   : > { %248 = vst [vmem:[#allocation2 + $0xd0] sm:$0xff] %v247_v1  ;;  %v257_v6 = vld [vmem:[%s1296_s1 + $0x30] sm:$0xff]  ;;  %v259_v7 = vld [vmem:[%s1296_s1 + $0x38] sm:$0xff]  ;;  %v261_v8 = vld [vmem:[%s1296_s1 + $0x40] sm:$0xff] }
  0x16   : > { %250 = vst [vmem:[#allocation2 + $0x10] sm:$0xff] %v249_v2  ;;  %v263_v9 = vld [vmem:[%s1296_s1 + $0x48] sm:$0xff]  ;;  %v265_v10 = vld [vmem:[%s1296_s1 + $0x50] sm:$0xff]  ;;  %v267_v11 = vld [vmem:[%s1296_s1 + $0x58] sm:$0xff] }
  0x17   : > { %252 = vst [vmem:[#allocation2 + $0x48] sm:$0xff] %v251_v3  ;;  %v269_v12 = vld [vmem:[%s1296_s1 + $0x60] sm:$0xff]  ;;  %v271_v13 = vld [vmem:[%s1296_s1 + $0x68] sm:$0xff]  ;;  %v273_v14 = vld [vmem:[%s1296_s1 + $0x70] sm:$0xff] }
  0x18   : > { %254 = vst [vmem:[#allocation2 + $0x160] sm:$0xff] %v253_v4  ;;  %v275_v15 = vld [vmem:[%s1296_s1 + $0x78] sm:$0xff]  ;;  %v277_v16 = vld [vmem:[%s1296_s1 + $0x80] sm:$0xff]  ;;  %v279_v17 = vld [vmem:[%s1296_s1 + $0x88] sm:$0xff] }
  0x19   : > { %256 = vst [vmem:[#allocation2 + $0x128] sm:$0xff] %v255_v5  ;;  %v281_v18 = vld [vmem:[%s1296_s1 + $0x90] sm:$0xff]  ;;  %v283_v19 = vld [vmem:[%s1296_s1 + $0x98] sm:$0xff]  ;;  %v285_v20 = vld [vmem:[%s1296_s1 + $0xa0] sm:$0xff] }
  0x1a   : > { %258 = vst [vmem:[#allocation2 + $0x40] sm:$0xff] %v257_v6  ;;  %v287_v21 = vld [vmem:[%s1296_s1 + $0xa8] sm:$0xff]  ;;  %v289_v22 = vld [vmem:[%s1296_s1 + $0xb0] sm:$0xff]  ;;  %v291_v23 = vld [vmem:[%s1296_s1 + $0xb8] sm:$0xff] }
  0x1b   : > { %260 = vst [vmem:[#allocation2 + $0x178] sm:$0xff] %v259_v7  ;;  %v293_v24 = vld [vmem:[%s1296_s1 + $0xc0] sm:$0xff]  ;;  %v295_v25 = vld [vmem:[%s1296_s1 + $0xc8] sm:$0xff]  ;;  %v297_v26 = vld [vmem:[%s1296_s1 + $0xd0] sm:$0xff] }
  0x1c   : > { %262 = vst [vmem:[#allocation2 + $0x108] sm:$0xff] %v261_v8  ;;  %v299_v27 = vld [vmem:[%s1296_s1 + $0xd8] sm:$0xff]  ;;  %v301_v28 = vld [vmem:[%s1296_s1 + $0xe0] sm:$0xff]  ;;  %v303_v29 = vld [vmem:[%s1296_s1 + $0xe8] sm:$0xff] }
  0x1d   : > { %264 = vst [vmem:[#allocation2 + $0x110] sm:$0xff] %v263_v9  ;;  %v305_v30 = vld [vmem:[%s1296_s1 + $0xf0] sm:$0xff]  ;;  %v307_v31 = vld [vmem:[%s1296_s1 + $0xf8] sm:$0xff]  ;;  %v309_v32 = vld [vmem:[%s1296_s1 + $0x100] sm:$0xff] }
  0x1e   : > { %266 = vst [vmem:[#allocation2 + $0x90] sm:$0xff] %v265_v10  ;;  %v311_v33 = vld [vmem:[%s1296_s1 + $0x108] sm:$0xff]  ;;  %v313_v34 = vld [vmem:[%s1296_s1 + $0x110] sm:$0xff]  ;;  %v315_v35 = vld [vmem:[%s1296_s1 + $0x118] sm:$0xff] }
  0x1f   : > { %268 = vst [vmem:[#allocation2 + $0x118] sm:$0xff] %v267_v11  ;;  %v317_v36 = vld [vmem:[%s1296_s1 + $0x120] sm:$0xff]  ;;  %v319_v37 = vld [vmem:[%s1296_s1 + $0x128] sm:$0xff]  ;;  %v321_v38 = vld [vmem:[%s1296_s1 + $0x130] sm:$0xff] }
  0x20   : > { %270 = vst [vmem:[#allocation2 + $0x148] sm:$0xff] %v269_v12  ;;  %v323_v39 = vld [vmem:[%s1296_s1 + $0x138] sm:$0xff]  ;;  %v325_v40 = vld [vmem:[%s1296_s1 + $0x140] sm:$0xff]  ;;  %v327_v41 = vld [vmem:[%s1296_s1 + $0x148] sm:$0xff] }
  0x21   : > { %272 = vst [vmem:[#allocation2 + $0x100] sm:$0xff] %v271_v13  ;;  %v329_v42 = vld [vmem:[%s1296_s1 + $0x150] sm:$0xff]  ;;  %v331_v43 = vld [vmem:[%s1296_s1 + $0x158] sm:$0xff]  ;;  %v333_v44 = vld [vmem:[%s1296_s1 + $0x160] sm:$0xff] }
  0x22   : > { %274 = vst [vmem:[#allocation2 + $0x58] sm:$0xff] %v273_v14  ;;  %v335_v45 = vld [vmem:[%s1296_s1 + $0x168] sm:$0xff]  ;;  %v337_v46 = vld [vmem:[%s1296_s1 + $0x170] sm:$0xff]  ;;  %v339_v47 = vld [vmem:[%s1296_s1 + $0x178] sm:$0xff] }
  0x23   : > { %276 = vst [vmem:[#allocation2 + $0xd8] sm:$0xff] %v275_v15  ;;  %v341_v48 = vld [vmem:[%s1296_s1 + $0x180] sm:$0xff]  ;;  %v343_v49 = vld [vmem:[%s1296_s1 + $0x188] sm:$0xff]  ;;  %v345_v50 = vld [vmem:[%s1296_s1 + $0x190] sm:$0xff] }
  0x24   : > { %278 = vst [vmem:[#allocation2 + $0x180] sm:$0xff] %v277_v16  ;;  %v347_v51 = vld [vmem:[%s1296_s1 + $0x198] sm:$0xff]  ;;  %v349_v52 = vld [vmem:[%s1296_s1 + $0x1a0] sm:$0xff]  ;;  %v351_v53 = vld [vmem:[%s1296_s1 + $0x1a8] sm:$0xff] }
  0x25   : > { %280 = vst [vmem:[#allocation2 + $0x130] sm:$0xff] %v279_v17 }
  0x26   : > { %282 = vst [vmem:[#allocation2 + $0x138] sm:$0xff] %v281_v18 }
  0x27   : > { %284 = vst [vmem:[#allocation2 + $0x78] sm:$0xff] %v283_v19 }
  0x28   : > { %286 = vst [vmem:[#allocation2 + $0x1a0] sm:$0xff] %v285_v20 }
  0x29   : > { %288 = vst [vmem:[#allocation2 + $0x158] sm:$0xff] %v287_v21 }
  0x2a   : > { %290 = vst [vmem:[#allocation2 + $0x98] sm:$0xff] %v289_v22 }
  0x2b   : > { %292 = vst [vmem:[#allocation2 + $0xe8] sm:$0xff] %v291_v23 }
  0x2c   : > { %294 = vst [vmem:[#allocation2 + $0x80] sm:$0xff] %v293_v24 }
  0x2d   : > { %296 = vst [vmem:[#allocation2 + $0xa8] sm:$0xff] %v295_v25 }
  0x2e   : > { %298 = vst [vmem:[#allocation2 + $0x28] sm:$0xff] %v297_v26 }
  0x2f   : > { %300 = vst [vmem:[#allocation2] sm:$0xff] %v299_v27 }
  0x30   : > { %302 = vst [vmem:[#allocation2 + $0x168] sm:$0xff] %v301_v28 }
  0x31   : > { %304 = vst [vmem:[#allocation2 + $0xb8] sm:$0xff] %v303_v29 }
  0x32   : > { %306 = vst [vmem:[#allocation2 + $0x1a8] sm:$0xff] %v305_v30 }
  0x33   : > { %308 = vst [vmem:[#allocation2 + $0x140] sm:$0xff] %v307_v31 }
  0x34   : > { %310 = vst [vmem:[#allocation2 + $0x50] sm:$0xff] %v309_v32 }
  0x35   : > { %312 = vst [vmem:[#allocation2 + $0xa0] sm:$0xff] %v311_v33 }
  0x36   : > { %314 = vst [vmem:[#allocation2 + $0x170] sm:$0xff] %v313_v34 }
  0x37   : > { %316 = vst [vmem:[#allocation2 + $0x198] sm:$0xff] %v315_v35 }
  0x38   : > { %318 = vst [vmem:[#allocation2 + $0xc0] sm:$0xff] %v317_v36 }
  0x39   : > { %320 = vst [vmem:[#allocation2 + $0x190] sm:$0xff] %v319_v37 }
  0x3a   : > { %322 = vst [vmem:[#allocation2 + $0xc8] sm:$0xff] %v321_v38 }
  0x3b   : > { %324 = vst [vmem:[#allocation2 + $0xf0] sm:$0xff] %v323_v39 }
  0x3c   : > { %326 = vst [vmem:[#allocation2 + $0x150] sm:$0xff] %v325_v40 }
  0x3d   : > { %328 = vst [vmem:[#allocation2 + $0x30] sm:$0xff] %v327_v41 }
  0x3e   : > { %330 = vst [vmem:[#allocation2 + $0xf8] sm:$0xff] %v329_v42 }
  0x3f   : > { %332 = vst [vmem:[#allocation2 + $0x18] sm:$0xff] %v331_v43 }
  0x40   : > { %334 = vst [vmem:[#allocation2 + $0x8] sm:$0xff] %v333_v44 }
  0x41   : > { %336 = vst [vmem:[#allocation2 + $0x60] sm:$0xff] %v335_v45 }
  0x42   : > { %338 = vst [vmem:[#allocation2 + $0x70] sm:$0xff] %v337_v46 }
  0x43   : > { %340 = vst [vmem:[#allocation2 + $0x68] sm:$0xff] %v339_v47 }
  0x44   : > { %342 = vst [vmem:[#allocation2 + $0x38] sm:$0xff] %v341_v48 }
  0x45   : > { %344 = vst [vmem:[#allocation2 + $0x20] sm:$0xff] %v343_v49 }
  0x46   : > { %346 = vst [vmem:[#allocation2 + $0x88] sm:$0xff] %v345_v50 }
  0x47   : > { %348 = vst [vmem:[#allocation2 + $0xe0] sm:$0xff] %v347_v51 }
  0x48   : > { %350 = vst [vmem:[#allocation2 + $0x120] sm:$0xff] %v349_v52 }
  0x49   : > { %352 = vst [vmem:[#allocation2 + $0x188] sm:$0xff] %v351_v53 }
  0x4a   : > { %358 = vsyncadd [#allocation3], 6912 }
  0x4b   : > { %950 = dma.done.wait [#allocation3], 6912 }
  0x4c   : > { %951 = vsyncadd [#allocation3], 4294960384  ;;  %v972_v54 = vmov 0.0  }
  0x4d   : > { %362 = vst [vmem:[%s1034_s27] sm:$0x1] %v972_v54 }
  0x4e   : > { %363 = vst [vmem:[%s1039_s30] sm:$0x1] %v972_v54 }
  0x4f PF: > { %v451_v55 = vld [vmem:[#allocation2 + $0x68] sm:$0xff]  ;;  %v450_v56 = vld [vmem:[#allocation2 + $0x70] sm:$0xff]  ;;  %v419_v57 = vld [vmem:[#allocation2 + $0xd8] sm:$0xff]  ;;  %vm458_vm0 = vcmask 392192  }
  0x50   : > { %583 = vmatpush.msra.mxu2 %v451_v55  ;;  %489 = vmatpush.msra.mxu0 %v419_v57  ;;  %v435_v58 = vld [vmem:[#allocation2 + $0x140] sm:$0xff]  ;;  %v418_v59 = vld [vmem:[#allocation2 + $0x58] sm:$0xff]  ;;  %v434_v61 = vld [vmem:[#allocation2 + $0x1a8] sm:$0xff] }
  0x51   : > { %536 = vmatpush.msra.mxu1 %v435_v58  ;;  %v449_v60 = vld [vmem:[#allocation2 + $0x60] sm:$0xff]  ;;  %v433_v63 = vld [vmem:[#allocation2 + $0xb8] sm:$0xff]  ;;  %v448_v0 = vld [vmem:[#allocation2 + $0x8] sm:$0xff] }
  0x52   : > { %v417_v62 = vld [vmem:[#allocation2 + $0x100] sm:$0xff]  ;;  %584 = vmatpush.msra.mxu2 %v450_v56  ;;  %490 = vmatpush.msra.mxu0 %v418_v59  ;;  %v416_v1 = vld [vmem:[#allocation2 + $0x148] sm:$0xff]  ;;  %v447_v3 = vld [vmem:[#allocation2 + $0x18] sm:$0xff] }
  0x53   : > { %537 = vmatpush.msra.mxu1 %v434_v61  ;;  %v432_v2 = vld [vmem:[#allocation2 + $0x168] sm:$0xff]  ;;  %v415_v4 = vld [vmem:[#allocation2 + $0x118] sm:$0xff]  ;;  %v431_v5 = vld [vmem:[#allocation2] sm:$0xff] }
  0x54   : > { %585 = vmatpush.msra.mxu2 %v449_v60  ;;  %491 = vmatpush.msra.mxu0 %v417_v62  ;;  %v446_v6 = vld [vmem:[#allocation2 + $0xf8] sm:$0xff]  ;;  %v414_v7 = vld [vmem:[#allocation2 + $0x90] sm:$0xff]  ;;  %v430_v8 = vld [vmem:[#allocation2 + $0x28] sm:$0xff] }
  0x55   : > { %538 = vmatpush.msra.mxu1 %v433_v63  ;;  %v445_v9 = vld [vmem:[#allocation2 + $0x30] sm:$0xff]  ;;  %v457_v11 = vld [vmem:[#allocation2 + $0x188] sm:$0xff]  ;;  %v456_v15 = vld [vmem:[#allocation2 + $0x120] sm:$0xff] }
  0x56   : > { %586 = vmatpush.msra.mxu2 %v448_v0  ;;  %492 = vmatpush.msra.mxu0 %v416_v1  ;;  %v413_v10 = vld [vmem:[#allocation2 + $0x110] sm:$0xff]  ;;  %v429_v12 = vld [vmem:[#allocation2 + $0xa8] sm:$0xff]  ;;  %v428_v16 = vld [vmem:[#allocation2 + $0x80] sm:$0xff] }
  0x57   : > { %539 = vmatpush.msra.mxu1 %v432_v2  ;;  %v444_v13 = vld [vmem:[#allocation2 + $0x150] sm:$0xff]  ;;  %v412_v14 = vld [vmem:[#allocation2 + $0x108] sm:$0xff]  ;;  %640 = vmatpush.msra.mxu3 %v457_v11  ;;  %v455_v17 = vld [vmem:[#allocation2 + $0xe0] sm:$0xff] }
  0x58   : > { %587 = vmatpush.msra.mxu2 %v447_v3  ;;  %493 = vmatpush.msra.mxu0 %v415_v4  ;;  %v443_v18 = vld [vmem:[#allocation2 + $0xf0] sm:$0xff]  ;;  %v411_v19 = vld [vmem:[#allocation2 + $0x178] sm:$0xff]  ;;  %v427_v20 = vld [vmem:[#allocation2 + $0xe8] sm:$0xff] }
  0x59   : > { %540 = vmatpush.msra.mxu1 %v431_v5  ;;  %641 = vmatpush.msra.mxu3 %v456_v15  ;;  %v454_v21 = vld [vmem:[#allocation2 + $0x88] sm:$0xff]  ;;  %v410_v23 = vld [vmem:[#allocation2 + $0x40] sm:$0xff]  ;;  %v426_v24 = vld [vmem:[#allocation2 + $0x98] sm:$0xff] }
  0x5a   : > { %588 = vmatpush.msra.mxu2 %v446_v6  ;;  %494 = vmatpush.msra.mxu0 %v414_v7  ;;  %v442_v22 = vld [vmem:[#allocation2 + $0xc8] sm:$0xff]  ;;  %v453_v25 = vld [vmem:[#allocation2 + $0x20] sm:$0xff]  ;;  %v441_v26 = vld [vmem:[#allocation2 + $0x190] sm:$0xff] }
  0x5b   : > { %541 = vmatpush.msra.mxu1 %v430_v8  ;;  %642 = vmatpush.msra.mxu3 %v455_v17  ;;  %v409_v27 = vld [vmem:[#allocation2 + $0x128] sm:$0xff]  ;;  %v425_v28 = vld [vmem:[#allocation2 + $0x158] sm:$0xff]  ;;  %v440_v30 = vld [vmem:[#allocation2 + $0xc0] sm:$0xff] }
  0x5c   : > { %589 = vmatpush.msra.mxu2 %v445_v9  ;;  %495 = vmatpush.msra.mxu0 %v413_v10  ;;  %v452_v29 = vld [vmem:[#allocation2 + $0x38] sm:$0xff]  ;;  %v408_v31 = vld [vmem:[#allocation2 + $0x160] sm:$0xff]  ;;  %v407_v35 = vld [vmem:[#allocation2 + $0x48] sm:$0xff] }
  0x5d   : > { %542 = vmatpush.msra.mxu1 %v429_v12  ;;  %643 = vmatpush.msra.mxu3 %v454_v21  ;;  %v424_v32 = vld [vmem:[#allocation2 + $0x1a0] sm:$0xff]  ;;  %v367_v33 = vld [vmem:[%s1044_s9 + $0x18] sm:$0xff]  ;;  %v438_v37 = vld [vmem:[#allocation2 + $0x170] sm:$0xff] }
  0x5e   : > { %590 = vmatpush.msra.mxu2 %v444_v13  ;;  %496 = vmatpush.msra.mxu0 %v412_v14  ;;  %v439_v34 = vld [vmem:[#allocation2 + $0x198] sm:$0xff]  ;;  %v406_v38 = vld [vmem:[#allocation2 + $0x10] sm:$0xff]  ;;  %v437_v40 = vld [vmem:[#allocation2 + $0xa0] sm:$0xff] }
  0x5f   : > { %543 = vmatpush.msra.mxu1 %v428_v16  ;;  %644 = vmatpush.msra.mxu3 %v453_v25  ;;  %v423_v36 = vld [vmem:[#allocation2 + $0x78] sm:$0xff]  ;;  %v405_v41 = vld [vmem:[#allocation2 + $0xd0] sm:$0xff]  ;;  %v420_v46 = vld [vmem:[#allocation2 + $0x180] sm:$0xff] }
  0x60   : > { %591 = vmatpush.msra.mxu2 %v443_v18  ;;  %497 = vmatpush.msra.mxu0 %v411_v19  ;;  %v422_v39 = vld [vmem:[#allocation2 + $0x138] sm:$0xff]  ;;  %v421_v42 = vld [vmem:[#allocation2 + $0x130] sm:$0xff]  ;;  %v364_v47 = vld [vmem:[%s1044_s9] sm:$0xff] }
  0x61   : > { %544 = vmatpush.msra.mxu1 %v427_v20  ;;  %645 = vmatpush.msra.mxu3 %v452_v29  ;;  %v436_v43 = vld [vmem:[#allocation2 + $0x50] sm:$0xff]  ;;  %v365_v48 = vld [vmem:[%s1044_s9 + $0x8] sm:$0xff]  ;;  %v371_v49 = vld [vmem:[%s1044_s9 + $0x38] sm:$0xff] }
  0x62   : > { %592 = vmatpush.msra.mxu2 %v442_v22  ;;  %498 = vmatpush.msra.mxu0 %v410_v23  ;;  %v404_v44 = vld [vmem:[#allocation2 + $0xb0] sm:$0xff]  ;;  %v368_v51 = vld [vmem:[%s1044_s9 + $0x20] sm:$0xff]  ;;  %v369_v52 = vld [vmem:[%s1044_s9 + $0x28] sm:$0xff] }
  0x63   : > { %545 = vmatpush.msra.mxu1 %v426_v24  ;;  %876 = vmatmul.msk.f32.vlgmr.msra.gmra.mxu3 %vm458_vm0, %v367_v33  ;;  %v366_v45 = vld [vmem:[%s1044_s9 + $0x10] sm:$0xff]  ;;  %v375_v53 = vld [vmem:[%s1044_s9 + $0x58] sm:$0xff]  ;;  %v372_v55 = vld [vmem:[%s1044_s9 + $0x40] sm:$0xff] }
  0x64   : > { %593 = vmatpush.msra.mxu2 %v441_v26  ;;  %499 = vmatpush.msra.mxu0 %v409_v27  ;;  %v370_v50 = vld [vmem:[%s1044_s9 + $0x30] sm:$0xff]  ;;  %v373_v56 = vld [vmem:[%s1044_s9 + $0x48] sm:$0xff]  ;;  %v379_v57 = vld [vmem:[%s1044_s9 + $0x78] sm:$0xff] }
  0x65   : > { %546 = vmatpush.msra.mxu1 %v425_v28  ;;  %v374_v54 = vld [vmem:[%s1044_s9 + $0x50] sm:$0xff]  ;;  %v376_v59 = vld [vmem:[%s1044_s9 + $0x60] sm:$0xff]  ;;  %v377_v60 = vld [vmem:[%s1044_s9 + $0x68] sm:$0xff] }
  0x66   : > { %594 = vmatpush.msra.mxu2 %v440_v30  ;;  %500 = vmatpush.msra.mxu0 %v408_v31  ;;  %v378_v58 = vld [vmem:[%s1044_s9 + $0x70] sm:$0xff]  ;;  %v383_v61 = vld [vmem:[%s1044_s9 + $0x98] sm:$0xff]  ;;  %v380_v63 = vld [vmem:[%s1044_s9 + $0x80] sm:$0xff] }
  0x67   : > { %547 = vmatpush.msra.mxu1 %v424_v32  ;;  %v382_v62 = vld [vmem:[%s1044_s9 + $0x90] sm:$0xff]  ;;  %v381_v0 = vld [vmem:[%s1044_s9 + $0x88] sm:$0xff]  ;;  %v387_v1 = vld [vmem:[%s1044_s9 + $0xb8] sm:$0xff] }
  0x68   : > { %595 = vmatpush.msra.mxu2 %v439_v34  ;;  %501 = vmatpush.msra.mxu0 %v407_v35  ;;  %v386_v2 = vld [vmem:[%s1044_s9 + $0xb0] sm:$0xff]  ;;  %v384_v3 = vld [vmem:[%s1044_s9 + $0xa0] sm:$0xff]  ;;  %v385_v4 = vld [vmem:[%s1044_s9 + $0xa8] sm:$0xff] }
  0x69   : > { %548 = vmatpush.msra.mxu1 %v423_v36  ;;  %v391_v5 = vld [vmem:[%s1044_s9 + $0xd8] sm:$0xff]  ;;  %v390_v6 = vld [vmem:[%s1044_s9 + $0xd0] sm:$0xff]  ;;  %v388_v7 = vld [vmem:[%s1044_s9 + $0xc0] sm:$0xff] }
  0x6a   : > { %596 = vmatpush.msra.mxu2 %v438_v37  ;;  %502 = vmatpush.msra.mxu0 %v406_v38  ;;  %v389_v8 = vld [vmem:[%s1044_s9 + $0xc8] sm:$0xff]  ;;  %v395_v9 = vld [vmem:[%s1044_s9 + $0xf8] sm:$0xff]  ;;  %v394_v10 = vld [vmem:[%s1044_s9 + $0xf0] sm:$0xff] }
  0x6b   : > { %549 = vmatpush.msra.mxu1 %v422_v39  ;;  %877 = vmatmul.msk.f32.gmra.mxu3 %vm458_vm0, %v371_v49  ;;  %v392_v11 = vld [vmem:[%s1044_s9 + $0xe0] sm:$0xff]  ;;  %v393_v12 = vld [vmem:[%s1044_s9 + $0xe8] sm:$0xff]  ;;  %v399_v13 = vld [vmem:[%s1044_s9 + $0x118] sm:$0xff] }
  0x6c   : > { %597 = vmatpush.msra.mxu2 %v437_v40  ;;  %503 = vmatpush.msra.mxu0 %v405_v41  ;;  %v398_v14 = vld [vmem:[%s1044_s9 + $0x110] sm:$0xff]  ;;  %v396_v15 = vld [vmem:[%s1044_s9 + $0x100] sm:$0xff]  ;;  %v397_v16 = vld [vmem:[%s1044_s9 + $0x108] sm:$0xff] }
  0x6d   : > { %550 = vmatpush.msra.mxu1 %v421_v42  ;;  %v403_v17 = vld [vmem:[%s1044_s9 + $0x138] sm:$0xff]  ;;  %v402_v18 = vld [vmem:[%s1044_s9 + $0x130] sm:$0xff]  ;;  %v400_v19 = vld [vmem:[%s1044_s9 + $0x120] sm:$0xff] }
  0x6e   : > { %598 = vmatpush.msra.mxu2 %v436_v43  ;;  %504 = vmatpush.msra.mxu0 %v404_v44  ;;  %v401_v20 = vld [vmem:[%s1044_s9 + $0x128] sm:$0xff] }
  0x6f   : > { %599 = vmatmul.f32.vlgmr.msra.gmra.mxu2 %v366_v45  ;;  %551 = vmatpush.msra.mxu1 %v420_v46 }
  0x70   : > { %505 = vmatmul.f32.vlgmr.msra.gmra.mxu0 %v364_v47  ;;  %552 = vmatmul.f32.vlgmr.msra.gmra.mxu1 %v365_v48 }
  0x73   : > { %878 = vmatmul.msk.f32.gmra.mxu3 %vm458_vm0, %v375_v53 }
  0x77   : > { %602 = vmatmul.f32.gmra.mxu2 %v370_v50 }
  0x78   : > { %508 = vmatmul.f32.gmra.mxu0 %v368_v51  ;;  %555 = vmatmul.f32.gmra.mxu1 %v369_v52 }
  0x7b   : > { %879 = vmatmul.msk.f32.gmra.mxu3 %vm458_vm0, %v379_v57 }
  0x7f   : > { %605 = vmatmul.f32.gmra.mxu2 %v374_v54 }
  0x80   : > { %511 = vmatmul.f32.gmra.mxu0 %v372_v55  ;;  %558 = vmatmul.f32.gmra.mxu1 %v373_v56 }
  0x83   : > { %880 = vmatmul.msk.f32.gmra.mxu3 %vm458_vm0, %v383_v61 }
  0x87   : > { %608 = vmatmul.f32.gmra.mxu2 %v378_v58 }
  0x88   : > { %514 = vmatmul.f32.gmra.mxu0 %v376_v59  ;;  %561 = vmatmul.f32.gmra.mxu1 %v377_v60 }
  0x8b   : > { %881 = vmatmul.msk.f32.gmra.mxu3 %vm458_vm0, %v387_v1 }
  0x8f   : > { %611 = vmatmul.f32.gmra.mxu2 %v382_v62 }
  0x90   : > { %517 = vmatmul.f32.gmra.mxu0 %v380_v63  ;;  %564 = vmatmul.f32.gmra.mxu1 %v381_v0 }
  0x93   : > { %882 = vmatmul.msk.f32.gmra.mxu3 %vm458_vm0, %v391_v5 }
  0x97   : > { %614 = vmatmul.f32.gmra.mxu2 %v386_v2 }
  0x98   : > { %520 = vmatmul.f32.gmra.mxu0 %v384_v3  ;;  %567 = vmatmul.f32.gmra.mxu1 %v385_v4 }
  0x9b   : > { %883 = vmatmul.msk.f32.gmra.mxu3 %vm458_vm0, %v395_v9 }
  0x9f   : > { %617 = vmatmul.f32.gmra.mxu2 %v390_v6 }
  0xa0   : > { %523 = vmatmul.f32.gmra.mxu0 %v388_v7  ;;  %570 = vmatmul.f32.gmra.mxu1 %v389_v8 }
  0xa3   : > { %884 = vmatmul.msk.f32.gmra.mxu3 %vm458_vm0, %v399_v13 }
  0xa7   : > { %620 = vmatmul.f32.gmra.mxu2 %v394_v10 }
  0xa8   : > { %526 = vmatmul.f32.gmra.mxu0 %v392_v11  ;;  %573 = vmatmul.f32.gmra.mxu1 %v393_v12 }
  0xab   : > { %885 = vmatmul.msk.f32.gmra.mxu3 %vm458_vm0, %v403_v17 }
  0xaf   : > { %623 = vmatmul.f32.gmra.mxu2 %v398_v14 }
  0xb0   : > { %529 = vmatmul.f32.gmra.mxu0 %v396_v15  ;;  %576 = vmatmul.f32.gmra.mxu1 %v397_v16 }
  0xb7   : > { %626 = vmatmul.f32.gmra.mxu2 %v402_v18 }
  0xb8   : > { %532 = vmatmul.f32.gmra.mxu0 %v400_v19  ;;  %579 = vmatmul.f32.gmra.mxu1 %v401_v20 }
  0xe6   : > { %v647_v21 = vpop.f32.mrf.mxu3 }
  0xed   : > { %v506_v22 = vpop.f32.mrf.mxu0  ;;  %v553_v23 = vpop.f32.mrf.mxu1 }
  0xee   : > { %v554_v24 = vadd.f32 %v553_v23, %v506_v22  ;;  %v650_v27 = vpop.f32.mrf.mxu3 }
  0xf2   : > { %v600_v25 = vpop.f32.mrf.mxu2 }
  0xf3   : > { %v601_v26 = vadd.f32 %v600_v25, %v554_v24 }
  0xf5   : > { %v648_v28 = vadd.f32 %v647_v21, %v601_v26  ;;  %v509_v29 = vpop.f32.mrf.mxu0  ;;  %v556_v30 = vpop.f32.mrf.mxu1 }
  0xf6   : > { %v557_v31 = vadd.f32 %v556_v30, %v509_v29  ;;  %v653_v34 = vpop.f32.mrf.mxu3 }
  0xf7   : > { %677 = vst [vmem:[%s1049_s12] sm:$0xff] %v648_v28  ;;  %v706_v16 = vmul.f32 %v648_v28, %v648_v28 }
  0xfa   : > { %v603_v32 = vpop.f32.mrf.mxu2 }
  0xfb   : > { %v604_v33 = vadd.f32 %v603_v32, %v557_v31 }
  0xfd   : > { %v651_v35 = vadd.f32 %v650_v27, %v604_v33  ;;  %v512_v36 = vpop.f32.mrf.mxu0  ;;  %v559_v37 = vpop.f32.mrf.mxu1 }
  0xfe   : > { %v560_v38 = vadd.f32 %v559_v37, %v512_v36  ;;  %v656_v41 = vpop.f32.mrf.mxu3 }
  0xff   : > { %678 = vst [vmem:[%s1049_s12 + $0x8] sm:$0xff] %v651_v35  ;;  %v707_v12 = vmul.f32 %v651_v35, %v651_v35  ;;  %v688_v17 = vadd.f32 %v651_v35, %v648_v28 }
 0x101   : > { %v716_v21 = vadd.f32 %v707_v12, %v706_v16 }
 0x102   : > { %v606_v39 = vpop.f32.mrf.mxu2 }
 0x103   : > { %v607_v40 = vadd.f32 %v606_v39, %v560_v38 }
 0x105   : > { %v654_v42 = vadd.f32 %v653_v34, %v607_v40  ;;  %v515_v43 = vpop.f32.mrf.mxu0  ;;  %v562_v44 = vpop.f32.mrf.mxu1 }
 0x106   : > { %v563_v45 = vadd.f32 %v562_v44, %v515_v43  ;;  %v659_v48 = vpop.f32.mrf.mxu3 }
 0x107   : > { %679 = vst [vmem:[%s1049_s12 + $0x10] sm:$0xff] %v654_v42  ;;  %v708_v18 = vmul.f32 %v654_v42, %v654_v42  ;;  %v689_v22 = vadd.f32 %v688_v17, %v654_v42 }
 0x109   : > { %v717_v25 = vadd.f32 %v716_v21, %v708_v18 }
 0x10a   : > { %v609_v46 = vpop.f32.mrf.mxu2 }
 0x10b   : > { %v610_v47 = vadd.f32 %v609_v46, %v563_v45 }
 0x10d   : > { %v657_v49 = vadd.f32 %v656_v41, %v610_v47  ;;  %v518_v50 = vpop.f32.mrf.mxu0  ;;  %v565_v51 = vpop.f32.mrf.mxu1 }
 0x10e   : > { %v566_v52 = vadd.f32 %v565_v51, %v518_v50  ;;  %v662_v55 = vpop.f32.mrf.mxu3 }
 0x10f   : > { %680 = vst [vmem:[%s1049_s12 + $0x18] sm:$0xff] %v657_v49  ;;  %v709_v23 = vmul.f32 %v657_v49, %v657_v49  ;;  %v690_v26 = vadd.f32 %v689_v22, %v657_v49 }
 0x111   : > { %v718_v30 = vadd.f32 %v717_v25, %v709_v23 }
 0x112   : > { %v612_v53 = vpop.f32.mrf.mxu2 }
 0x113   : > { %v613_v54 = vadd.f32 %v612_v53, %v566_v52 }
 0x115   : > { %v660_v56 = vadd.f32 %v659_v48, %v613_v54  ;;  %v521_v57 = vpop.f32.mrf.mxu0  ;;  %v568_v58 = vpop.f32.mrf.mxu1 }
 0x116   : > { %v569_v59 = vadd.f32 %v568_v58, %v521_v57  ;;  %v665_v62 = vpop.f32.mrf.mxu3 }
 0x117   : > { %681 = vst [vmem:[%s1049_s12 + $0x20] sm:$0xff] %v660_v56  ;;  %v710_v27 = vmul.f32 %v660_v56, %v660_v56  ;;  %v691_v31 = vadd.f32 %v690_v26, %v660_v56 }
 0x119   : > { %v719_v28 = vadd.f32 %v718_v30, %v710_v27 }
 0x11a   : > { %v615_v60 = vpop.f32.mrf.mxu2 }
 0x11b   : > { %v616_v61 = vadd.f32 %v615_v60, %v569_v59 }
 0x11d   : > { %v663_v63 = vadd.f32 %v662_v55, %v616_v61  ;;  %v524_v0 = vpop.f32.mrf.mxu0  ;;  %v571_v1 = vpop.f32.mrf.mxu1 }
 0x11e   : > { %v572_v2 = vadd.f32 %v571_v1, %v524_v0  ;;  %v668_v8 = vpop.f32.mrf.mxu3  ;;  %v687_v0 = vld [vmem:[%s1034_s27] sm:$0x1] }
 0x11f   : > { %682 = vst [vmem:[%s1049_s12 + $0x28] sm:$0xff] %v663_v63  ;;  %v711_v32 = vmul.f32 %v663_v63, %v663_v63  ;;  %v692_v35 = vadd.f32 %v691_v31, %v663_v63 }
 0x121   : > { %v720_v39 = vadd.f32 %v719_v28, %v711_v32 }
 0x122   : > { %v618_v3 = vpop.f32.mrf.mxu2 }
 0x123   : > { %v619_v4 = vadd.f32 %v618_v3, %v572_v2  ;;  %v705_v3 = vld [vmem:[%s1039_s30] sm:$0x1] }
 0x125   : > { %v666_v5 = vadd.f32 %v665_v62, %v619_v4  ;;  %v527_v6 = vpop.f32.mrf.mxu0  ;;  %v574_v7 = vpop.f32.mrf.mxu1 }
 0x126   : > { %v575_v9 = vadd.f32 %v574_v7, %v527_v6  ;;  %v671_v20 = vpop.f32.mrf.mxu3 }
 0x127   : > { %683 = vst [vmem:[%s1049_s12 + $0x30] sm:$0xff] %v666_v5  ;;  %v712_v37 = vmul.f32 %v666_v5, %v666_v5  ;;  %v693_v40 = vadd.f32 %v692_v35, %v666_v5 }
 0x129   : > { %v721_v44 = vadd.f32 %v720_v39, %v712_v37 }
 0x12a   : > { %v621_v10 = vpop.f32.mrf.mxu2 }
 0x12b   : > { %v622_v11 = vadd.f32 %v621_v10, %v575_v9 }
 0x12d   : > { %v669_v13 = vadd.f32 %v668_v8, %v622_v11  ;;  %v530_v14 = vpop.f32.mrf.mxu0  ;;  %v577_v15 = vpop.f32.mrf.mxu1 }
 0x12e   : > { %v578_v19 = vadd.f32 %v577_v15, %v530_v14  ;;  %v674_v43 = vpop.f32.mrf.mxu3 }
 0x12f   : > { %684 = vst [vmem:[%s1049_s12 + $0x38] sm:$0xff] %v669_v13  ;;  %v713_v41 = vmul.f32 %v669_v13, %v669_v13  ;;  %v694_v45 = vadd.f32 %v693_v40, %v669_v13 }
 0x131   : > { %v722_v48 = vadd.f32 %v721_v44, %v713_v41 }
 0x132   : > { %v624_v24 = vpop.f32.mrf.mxu2 }
 0x133   : > { %v625_v29 = vadd.f32 %v624_v24, %v578_v19 }
 0x135   : > { %v672_v33 = vadd.f32 %v671_v20, %v625_v29  ;;  %v533_v34 = vpop.f32.mrf.mxu0  ;;  %v580_v36 = vpop.f32.mrf.mxu1 }
 0x136   : > { %v581_v38 = vadd.f32 %v580_v36, %v533_v34 }
 0x137   : > { %685 = vst [vmem:[%s1049_s12 + $0x40] sm:$0xff] %v672_v33  ;;  %v714_v46 = vmul.f32 %v672_v33, %v672_v33  ;;  %v695_v49 = vadd.f32 %v694_v45, %v672_v33 }
 0x139   : > { %v723_v51 = vadd.f32 %v722_v48, %v714_v46 }
 0x13a   : > { %v627_v42 = vpop.f32.mrf.mxu2 }
 0x13b   : > { %v628_v47 = vadd.f32 %v627_v42, %v581_v38 }
 0x13d   : > { %v675_v50 = vadd.f32 %v674_v43, %v628_v47 }
 0x13f   : > { %686 = vst [vmem:[%s1049_s12 + $0x48] sm:$0xff] %v675_v50  ;;  %v696_v52 = vadd.f32 %v695_v49, %v675_v50  ;;  %v715_v53 = vmul.f32 %v675_v50, %v675_v50 }
 0x141   : > { %v697_v54 = vrot.slane %v696_v52, 4  ;;  %v724_v55 = vadd.f32 %v723_v51, %v715_v53 }
 0x143   : > { %v698_v56 = vadd.f32 %v697_v54, %v696_v52  ;;  %v725_v57 = vrot.slane %v724_v55, 4 }
 0x145   : > { %v699_v58 = vrot.slane %v698_v56, 2  ;;  %v726_v59 = vadd.f32 %v725_v57, %v724_v55 }
 0x147   : > { %v700_v60 = vadd.f32 %v699_v58, %v698_v56  ;;  %v727_v61 = vrot.slane %v726_v59, 2 }
 0x149   : > { %v701_v62 = vrot.slane %v700_v60, 1  ;;  %v728_v63 = vadd.f32 %v727_v61, %v726_v59 }
 0x14b   : > { %v702_v1 = vadd.f32 %v701_v62, %v700_v60  ;;  %v729_v2 = vrot.slane %v728_v63, 1 }
 0x14d   : > { %v703_v4 = vadd.f32 %v702_v1, %v687_v0  ;;  %v730_v5 = vadd.f32 %v729_v2, %v728_v63 }
 0x14f   : > { %704 = vst [vmem:[%s1034_s27] sm:$0x1] %v703_v4  ;;  %v731_v6 = vadd.f32 %v730_v5, %v705_v3 }
 0x151   : > { %732 = vst [vmem:[%s1039_s30] sm:$0x1] %v731_v6 }
 0x152 PF: > { %s15_s19 = sadd.s32 1, %s970_s19   ;;  %s1300_s15 = smov %s962_s17 }
 0x153   : > { %p12_p8 = scmp.ge.s32.totalorder %s15_s19, 6   ;;  %s1301_s16 = smov %s966_s18 }
 0x154   : > { %s1302_s17 = smov %s1305_s20  ;;  %s1303_s18 = smov %s1309_s21 }
 0x155   :  { %14 = sbr.rel (!%p12_p8) target bundleno = 3 (0x3), region = 106 }

// kernel: tile.18
= control target key start
LH: loop header
LB: loop body
LE: loop exit
PB: predicated region body
PF: predicated region fallthrough
CT: control target
= control target key end

     0   :  { %s28_s0 = inlined_call_operand.vmem [shape: f32[8], index: 0, kind: input, shape index: {}]   ;;  %s29_s1 = inlined_call_operand.vmem [shape: f32[10,8], index: 1, kind: output, shape index: {}]  }
   0x1   :  { %v4_v0 = vld [vmem:[%s28_s0] ss:$0 sm:$0xff] }
   0x2   :  { %5 = vst [vmem:[%s29_s1] sm:$0xff] %v4_v0 }
   0x3   :  { %8 = vst [vmem:[%s29_s1 + $0x8] sm:$0xff] %v4_v0 }

// kernel: tile.19
= control target key start
LH: loop header
LB: loop body
LE: loop exit
PB: predicated region body
PF: predicated region fallthrough
CT: control target
= control target key end

     0   :  { %s83_s10 = smov 72   ;;  %s84_s11 = smov 56   ;;  %vm3_vm0 = vcmask 64512   ;;  %vm9_vm1 = vcmask 654912   ;;  %vm15_vm2 = vcmask 589312   ;;  %vm21_vm3 = vcmask 523712   ;;  %s135_s0 = inlined_call_operand.vmem [shape: f32[10,8], index: 0, kind: input, shape index: {}]   ;;  %s136_s1 = inlined_call_operand.vmem [shape: f32[80], index: 1, kind: output, shape index: {}]  }
   0x1   :  { %v65_v0 = vld [vmem:[%s135_s0 + $0x9] sm:$0x1]   ;;  %v67_v1 = vld [vmem:[%s135_s0 + $0x7] sm:$0x1]   ;;  %v69_v2 = vld [vmem:[%s135_s0 + $0x5] sm:$0x1]  }
   0x2   :  { %7 = vrot.lane.b32.xlu0 %v65_v0, %s83_s10  ;;  %19 = vrot.lane.b32.xlu1 %v67_v1, %s84_s11  ;;  %s85_s14 = smov 40   ;;  %v66_v3 = vld [vmem:[%s135_s0 + $0x8] sm:$0x1]   ;;  %v68_v4 = vld [vmem:[%s135_s0 + $0x6] sm:$0x1]   ;;  %s86_s19 = smov 64  }
   0x3   :  { %31 = vrot.lane.b32.xlu2 %v69_v2, %s85_s14  ;;  %s87_s20 = smov 48   ;;  %v70_v5 = vld [vmem:[%s135_s0 + $0x4] sm:$0x1]   ;;  %s88_s23 = smov 32   ;;  %v71_v6 = vld [vmem:[%s135_s0 + $0x3] sm:$0x1]  }
   0x4   :  { %v72_v7 = vld [vmem:[%s135_s0 + $0x2] sm:$0x1]   ;;  %s89_s28 = smov 24   ;;  %s90_s29 = smov 16   ;;  %v73_v8 = vld [vmem:[%s135_s0 + $0x1] sm:$0x1]  }
   0x5   :  { %s91_s3 = smov 8   ;;  %v2_v9 = vld [vmem:[%s135_s0] sm:$0x1]   ;;  %vm27_vm4 = vcmask 458112   ;;  %vm33_vm5 = vcmask 392512   ;;  %vm39_vm6 = vcmask 326912  }
   0x6   :  { %4 = vst.msk [vmem:[#allocation0] sm:$0x1] %vm3_vm0, %v2_v9   ;;  %vm45_vm7 = vcmask 261312   ;;  %vm51_vm8 = vcmask 195712   ;;  %vm57_vm9 = vcmask 130112  }
   0xa   :  { %13 = vrot.lane.b32.xlu0 %v66_v3, %s86_s19  ;;  %25 = vrot.lane.b32.xlu1 %v68_v4, %s87_s20 }
   0xb   :  { %37 = vrot.lane.b32.xlu2 %v70_v5, %s88_s23 }
  0x12   :  { %43 = vrot.lane.b32.xlu0 %v71_v6, %s89_s28  ;;  %49 = vrot.lane.b32.xlu1 %v72_v7, %s90_s29 }
  0x13   :  { %55 = vrot.lane.b32.xlu2 %v73_v8, %s91_s3 }
  0x5d   :  { %v32_v10 = vpop.permute.xlu2 %31  }
  0x65   :  { %v38_v11 = vpop.permute.xlu2 %37  }
  0x6d   :  { %v56_v12 = vpop.permute.xlu2 %55  }
  0x74   :  { %v8_v13 = vpop.permute.xlu0 %7   ;;  %v20_v14 = vpop.permute.xlu1 %19  }
  0x75   :  { %10 = vst.msk [vmem:[#allocation0] sm:$0x1] %vm9_vm1, %v8_v13  }
  0x7c   :  { %v14_v15 = vpop.permute.xlu0 %13   ;;  %v26_v16 = vpop.permute.xlu1 %25  }
  0x7d   :  { %16 = vst.msk [vmem:[#allocation0] sm:$0x1] %vm15_vm2, %v14_v15  }
  0x7e   :  { %22 = vst.msk [vmem:[#allocation0] sm:$0x1] %vm21_vm3, %v20_v14  }
  0x7f   :  { %28 = vst.msk [vmem:[#allocation0] sm:$0x1] %vm27_vm4, %v26_v16  }
  0x80   :  { %34 = vst.msk [vmem:[#allocation0] sm:$0x1] %vm33_vm5, %v32_v10  }
  0x81   :  { %40 = vst.msk [vmem:[#allocation0] sm:$0x1] %vm39_vm6, %v38_v11  }
  0x84   :  { %v44_v17 = vpop.permute.xlu0 %43   ;;  %v50_v18 = vpop.permute.xlu1 %49  }
  0x85   :  { %46 = vst.msk [vmem:[#allocation0] sm:$0x1] %vm45_vm7, %v44_v17  }
  0x86   :  { %52 = vst.msk [vmem:[#allocation0] sm:$0x1] %vm51_vm8, %v50_v18  }
  0x87   :  { %58 = vst.msk [vmem:[#allocation0] sm:$0x1] %vm57_vm9, %v56_v12  }
  0x8e   :  { %v61_v19 = vld [vmem:[#allocation0] sm:$0x1] }
  0x8f   :  { %64 = vst [vmem:[%s136_s1] sm:$0x1] %v61_v19 }

// kernel: deconv3d_unit.3
= control target key start
LH: loop header
LB: loop body
LE: loop exit
PB: predicated region body
PF: predicated region fallthrough
CT: control target
= control target key end

     0   :  { %s578_s0 = inlined_call_operand.vmem [shape: f32[320,128], index: 0, kind: input, shape index: {}]   ;;  %s579_s1 = inlined_call_operand.vmem [shape: f32[1,128], index: 1, kind: input, shape index: {}]   ;;  %s580_s2 = inlined_call_operand.vmem [shape: f32[1,128], index: 2, kind: input, shape index: {}]   ;;  %s581_s3 = inlined_call_operand.vmem [shape: f32[320,128], index: 3, kind: output, shape index: {}]  }
   0x1   :  { %v14_v0 = vld [vmem:[%s578_s0] sm:$0xff]  ;;  %v15_v3 = vld [vmem:[%s578_s0 + $0x8] sm:$0xff]  ;;  %v16_v6 = vld [vmem:[%s578_s0 + $0x10] sm:$0xff] }
   0x2   :  { %v254_v1 = vld [vmem:[%s579_s1] ss:$0 sm:$0xff]  ;;  %v17_v7 = vld [vmem:[%s578_s0 + $0x18] sm:$0xff]  ;;  %v19_v12 = vld [vmem:[%s578_s0 + $0x28] sm:$0xff] }
   0x3   :  { %v259_v2 = vld [vmem:[%s580_s2] ss:$0 sm:$0xff]  ;;  %v58_v4 = vmul.f32 %v254_v1, %v14_v0  ;;  %v59_v5 = vmul.f32 %v254_v1, %v15_v3  ;;  %v60_v9 = vmul.f32 %v254_v1, %v16_v6  ;;  %v61_v10 = vmul.f32 %v254_v1, %v17_v7  ;;  %v20_v13 = vld [vmem:[%s578_s0 + $0x30] sm:$0xff]  ;;  %v21_v14 = vld [vmem:[%s578_s0 + $0x38] sm:$0xff] }
   0x4   :  { %v18_v8 = vld [vmem:[%s578_s0 + $0x20] sm:$0xff]  ;;  %v63_v17 = vmul.f32 %v254_v1, %v19_v12  ;;  %v64_v18 = vmul.f32 %v254_v1, %v20_v13  ;;  %v65_v22 = vmul.f32 %v254_v1, %v21_v14  ;;  %v23_v24 = vld [vmem:[%s578_s0 + $0x48] sm:$0xff]  ;;  %v24_v29 = vld [vmem:[%s578_s0 + $0x50] sm:$0xff] }
   0x5   :  { %v62_v11 = vmul.f32 %v254_v1, %v18_v8  ;;  %v102_v15 = vadd.f32 %v259_v2, %v58_v4  ;;  %v103_v16 = vadd.f32 %v259_v2, %v59_v5  ;;  %v104_v19 = vadd.f32 %v259_v2, %v60_v9  ;;  %v22_v23 = vld [vmem:[%s578_s0 + $0x40] sm:$0xff]  ;;  %v25_v30 = vld [vmem:[%s578_s0 + $0x58] sm:$0xff]  ;;  %v27_v35 = vld [vmem:[%s578_s0 + $0x68] sm:$0xff] }
   0x6   :  { %v105_v20 = vadd.f32 %v259_v2, %v61_v10  ;;  %v107_v27 = vadd.f32 %v259_v2, %v63_v17  ;;  %v108_v28 = vadd.f32 %v259_v2, %v64_v18  ;;  %v26_v31 = vld [vmem:[%s578_s0 + $0x60] sm:$0xff]  ;;  %v109_v34 = vadd.f32 %v259_v2, %v65_v22  ;;  %v28_v36 = vld [vmem:[%s578_s0 + $0x70] sm:$0xff]  ;;  %v29_v41 = vld [vmem:[%s578_s0 + $0x78] sm:$0xff] }
   0x7   :  { %v106_v21 = vadd.f32 %v259_v2, %v62_v11  ;;  %v142_v25 = vmax.f32 %v102_v15, 0.0  ;;  %v143_v26 = vmax.f32 %v103_v16, 0.0  ;;  %v144_v32 = vmax.f32 %v104_v19, 0.0  ;;  %v30_v54 = vld [vmem:[%s578_s0 + $0x80] sm:$0xff]  ;;  %v31_v55 = vld [vmem:[%s578_s0 + $0x88] sm:$0xff]  ;;  %v32_v58 = vld [vmem:[%s578_s0 + $0x90] sm:$0xff] }
   0x8   :  { %v145_v33 = vmax.f32 %v105_v20, 0.0  ;;  %v147_v38 = vmax.f32 %v107_v27, 0.0  ;;  %v66_v39 = vmul.f32 %v254_v1, %v22_v23  ;;  %v67_v40 = vmul.f32 %v254_v1, %v23_v24  ;;  %v33_v59 = vld [vmem:[%s578_s0 + $0x98] sm:$0xff]  ;;  %v34_v62 = vld [vmem:[%s578_s0 + $0xa0] sm:$0xff]  ;;  %v35_v5 = vld [vmem:[%s578_s0 + $0xa8] sm:$0xff] }
   0x9   :  { %182 = vst [vmem:[%s581_s3] sm:$0xff] %v142_v25  ;;  %v146_v37 = vmax.f32 %v106_v21, 0.0  ;;  %v148_v42 = vmax.f32 %v108_v28, 0.0  ;;  %v68_v43 = vmul.f32 %v254_v1, %v24_v29  ;;  %v69_v44 = vmul.f32 %v254_v1, %v25_v30  ;;  %v36_v10 = vld [vmem:[%s578_s0 + $0xb0] sm:$0xff]  ;;  %v37_v14 = vld [vmem:[%s578_s0 + $0xb8] sm:$0xff]  ;;  %v38_v18 = vld [vmem:[%s578_s0 + $0xc0] sm:$0xff] }
   0xa   :  { %183 = vst [vmem:[%s581_s3 + $0x8] sm:$0xff] %v143_v26  ;;  %v70_v45 = vmul.f32 %v254_v1, %v26_v31  ;;  %v110_v46 = vadd.f32 %v259_v2, %v66_v39  ;;  %v111_v47 = vadd.f32 %v259_v2, %v67_v40  ;;  %v71_v48 = vmul.f32 %v254_v1, %v27_v35  ;;  %v39_v22 = vld [vmem:[%s578_s0 + $0xc8] sm:$0xff]  ;;  %v40_v26 = vld [vmem:[%s578_s0 + $0xd0] sm:$0xff]  ;;  %v41_v30 = vld [vmem:[%s578_s0 + $0xd8] sm:$0xff] }
   0xb   :  { %184 = vst [vmem:[%s581_s3 + $0x10] sm:$0xff] %v144_v32  ;;  %v72_v49 = vmul.f32 %v254_v1, %v28_v36  ;;  %v149_v50 = vmax.f32 %v109_v34, 0.0  ;;  %v112_v51 = vadd.f32 %v259_v2, %v68_v43  ;;  %v113_v52 = vadd.f32 %v259_v2, %v69_v44  ;;  %v42_v34 = vld [vmem:[%s578_s0 + $0xe0] sm:$0xff] }
   0xc   :  { %185 = vst [vmem:[%s581_s3 + $0x18] sm:$0xff] %v145_v33  ;;  %v73_v53 = vmul.f32 %v254_v1, %v29_v41  ;;  %v150_v56 = vmax.f32 %v110_v46, 0.0  ;;  %v114_v57 = vadd.f32 %v259_v2, %v70_v45  ;;  %v151_v60 = vmax.f32 %v111_v47, 0.0  ;;  %v45_v46 = vld [vmem:[%s578_s0 + $0xf8] sm:$0xff] }
   0xd   :  { %186 = vst [vmem:[%s581_s3 + $0x20] sm:$0xff] %v146_v37  ;;  %v115_v61 = vadd.f32 %v259_v2, %v71_v48  ;;  %v152_v63 = vmax.f32 %v112_v51, 0.0  ;;  %v116_v0 = vadd.f32 %v259_v2, %v72_v49  ;;  %v74_v3 = vmul.f32 %v254_v1, %v30_v54  ;;  %v47_v54 = vld [vmem:[%s578_s0 + $0x108] sm:$0xff] }
   0xe   :  { %187 = vst [vmem:[%s581_s3 + $0x28] sm:$0xff] %v147_v38  ;;  %v75_v4 = vmul.f32 %v254_v1, %v31_v55  ;;  %v153_v6 = vmax.f32 %v113_v52, 0.0  ;;  %v117_v7 = vadd.f32 %v259_v2, %v73_v53  ;;  %v76_v8 = vmul.f32 %v254_v1, %v32_v58  ;;  %v43_v38 = vld [vmem:[%s578_s0 + $0xe8] sm:$0xff]  ;;  %v48_v58 = vld [vmem:[%s578_s0 + $0x110] sm:$0xff] }
   0xf   :  { %188 = vst [vmem:[%s581_s3 + $0x30] sm:$0xff] %v148_v42  ;;  %v77_v9 = vmul.f32 %v254_v1, %v33_v59  ;;  %v154_v11 = vmax.f32 %v114_v57, 0.0  ;;  %v118_v12 = vadd.f32 %v259_v2, %v74_v3  ;;  %v78_v13 = vmul.f32 %v254_v1, %v34_v62  ;;  %v44_v42 = vld [vmem:[%s578_s0 + $0xf0] sm:$0xff]  ;;  %v49_v62 = vld [vmem:[%s578_s0 + $0x118] sm:$0xff] }
  0x10   :  { %189 = vst [vmem:[%s581_s3 + $0x38] sm:$0xff] %v149_v50  ;;  %v155_v15 = vmax.f32 %v115_v61, 0.0  ;;  %v119_v16 = vadd.f32 %v259_v2, %v75_v4  ;;  %v79_v17 = vmul.f32 %v254_v1, %v35_v5  ;;  %v156_v19 = vmax.f32 %v116_v0, 0.0  ;;  %v46_v50 = vld [vmem:[%s578_s0 + $0x100] sm:$0xff] }
  0x11   :  { %190 = vst [vmem:[%s581_s3 + $0x40] sm:$0xff] %v150_v56  ;;  %v120_v20 = vadd.f32 %v259_v2, %v76_v8  ;;  %v80_v21 = vmul.f32 %v254_v1, %v36_v10  ;;  %v157_v23 = vmax.f32 %v117_v7, 0.0  ;;  %v121_v24 = vadd.f32 %v259_v2, %v77_v9  ;;  %v50_v4 = vld [vmem:[%s578_s0 + $0x120] sm:$0xff]  ;;  %v51_v8 = vld [vmem:[%s578_s0 + $0x128] sm:$0xff] }
  0x12   :  { %191 = vst [vmem:[%s581_s3 + $0x48] sm:$0xff] %v151_v60  ;;  %v81_v25 = vmul.f32 %v254_v1, %v37_v14  ;;  %v158_v27 = vmax.f32 %v118_v12, 0.0  ;;  %v122_v28 = vadd.f32 %v259_v2, %v78_v13  ;;  %v82_v29 = vmul.f32 %v254_v1, %v38_v18  ;;  %v52_v12 = vld [vmem:[%s578_s0 + $0x130] sm:$0xff] }
  0x13   :  { %192 = vst [vmem:[%s581_s3 + $0x50] sm:$0xff] %v152_v63  ;;  %v159_v31 = vmax.f32 %v119_v16, 0.0  ;;  %v123_v32 = vadd.f32 %v259_v2, %v79_v17  ;;  %v83_v33 = vmul.f32 %v254_v1, %v39_v22  ;;  %v160_v35 = vmax.f32 %v120_v20, 0.0  ;;  %v53_v16 = vld [vmem:[%s578_s0 + $0x138] sm:$0xff] }
  0x14   :  { %193 = vst [vmem:[%s581_s3 + $0x58] sm:$0xff] %v153_v6  ;;  %v124_v36 = vadd.f32 %v259_v2, %v80_v21  ;;  %v84_v37 = vmul.f32 %v254_v1, %v40_v26  ;;  %v161_v39 = vmax.f32 %v121_v24, 0.0  ;;  %v125_v40 = vadd.f32 %v259_v2, %v81_v25 }
  0x15   :  { %194 = vst [vmem:[%s581_s3 + $0x60] sm:$0xff] %v154_v11  ;;  %v85_v41 = vmul.f32 %v254_v1, %v41_v30  ;;  %v162_v43 = vmax.f32 %v122_v28, 0.0  ;;  %v126_v44 = vadd.f32 %v259_v2, %v82_v29  ;;  %v86_v45 = vmul.f32 %v254_v1, %v42_v34 }
  0x16   :  { %195 = vst [vmem:[%s581_s3 + $0x68] sm:$0xff] %v155_v15  ;;  %v163_v47 = vmax.f32 %v123_v32, 0.0  ;;  %v127_v48 = vadd.f32 %v259_v2, %v83_v33  ;;  %v87_v49 = vmul.f32 %v254_v1, %v43_v38  ;;  %v164_v51 = vmax.f32 %v124_v36, 0.0 }
  0x17   :  { %196 = vst [vmem:[%s581_s3 + $0x70] sm:$0xff] %v156_v19  ;;  %v128_v52 = vadd.f32 %v259_v2, %v84_v37  ;;  %v88_v53 = vmul.f32 %v254_v1, %v44_v42  ;;  %v165_v55 = vmax.f32 %v125_v40, 0.0  ;;  %v129_v56 = vadd.f32 %v259_v2, %v85_v41 }
  0x18   :  { %197 = vst [vmem:[%s581_s3 + $0x78] sm:$0xff] %v157_v23  ;;  %v89_v57 = vmul.f32 %v254_v1, %v45_v46  ;;  %v166_v59 = vmax.f32 %v126_v44, 0.0  ;;  %v130_v60 = vadd.f32 %v259_v2, %v86_v45  ;;  %v90_v61 = vmul.f32 %v254_v1, %v46_v50 }
  0x19   :  { %198 = vst [vmem:[%s581_s3 + $0x80] sm:$0xff] %v158_v27  ;;  %v167_v63 = vmax.f32 %v127_v48, 0.0  ;;  %v131_v0 = vadd.f32 %v259_v2, %v87_v49  ;;  %v91_v3 = vmul.f32 %v254_v1, %v47_v54  ;;  %v168_v5 = vmax.f32 %v128_v52, 0.0 }
  0x1a   :  { %199 = vst [vmem:[%s581_s3 + $0x88] sm:$0xff] %v159_v31  ;;  %v132_v6 = vadd.f32 %v259_v2, %v88_v53  ;;  %v92_v7 = vmul.f32 %v254_v1, %v48_v58  ;;  %v169_v9 = vmax.f32 %v129_v56, 0.0  ;;  %v133_v10 = vadd.f32 %v259_v2, %v89_v57 }
  0x1b   :  { %200 = vst [vmem:[%s581_s3 + $0x90] sm:$0xff] %v160_v35  ;;  %v93_v11 = vmul.f32 %v254_v1, %v49_v62  ;;  %v170_v13 = vmax.f32 %v130_v60, 0.0  ;;  %v134_v14 = vadd.f32 %v259_v2, %v90_v61  ;;  %v94_v15 = vmul.f32 %v254_v1, %v50_v4 }
  0x1c   :  { %201 = vst [vmem:[%s581_s3 + $0x98] sm:$0xff] %v161_v39  ;;  %v171_v17 = vmax.f32 %v131_v0, 0.0  ;;  %v135_v18 = vadd.f32 %v259_v2, %v91_v3  ;;  %v95_v19 = vmul.f32 %v254_v1, %v51_v8  ;;  %v172_v20 = vmax.f32 %v132_v6, 0.0 }
  0x1d   :  { %202 = vst [vmem:[%s581_s3 + $0xa0] sm:$0xff] %v162_v43  ;;  %v136_v21 = vadd.f32 %v259_v2, %v92_v7  ;;  %v96_v22 = vmul.f32 %v254_v1, %v52_v12  ;;  %v173_v23 = vmax.f32 %v133_v10, 0.0  ;;  %v137_v24 = vadd.f32 %v259_v2, %v93_v11 }
  0x1e   :  { %203 = vst [vmem:[%s581_s3 + $0xa8] sm:$0xff] %v163_v47  ;;  %v97_v25 = vmul.f32 %v254_v1, %v53_v16  ;;  %v174_v26 = vmax.f32 %v134_v14, 0.0  ;;  %v138_v27 = vadd.f32 %v259_v2, %v94_v15  ;;  %v175_v28 = vmax.f32 %v135_v18, 0.0 }
  0x1f   :  { %204 = vst [vmem:[%s581_s3 + $0xb0] sm:$0xff] %v164_v51  ;;  %v139_v29 = vadd.f32 %v259_v2, %v95_v19  ;;  %v176_v30 = vmax.f32 %v136_v21, 0.0  ;;  %v140_v1 = vadd.f32 %v259_v2, %v96_v22  ;;  %v177_v31 = vmax.f32 %v137_v24, 0.0 }
  0x20   :  { %205 = vst [vmem:[%s581_s3 + $0xb8] sm:$0xff] %v165_v55  ;;  %v141_v32 = vadd.f32 %v259_v2, %v97_v25  ;;  %v178_v33 = vmax.f32 %v138_v27, 0.0 }
  0x21   :  { %206 = vst [vmem:[%s581_s3 + $0xc0] sm:$0xff] %v166_v59  ;;  %v179_v34 = vmax.f32 %v139_v29, 0.0  ;;  %v180_v35 = vmax.f32 %v140_v1, 0.0 }
  0x22   :  { %207 = vst [vmem:[%s581_s3 + $0xc8] sm:$0xff] %v167_v63  ;;  %v181_v2 = vmax.f32 %v141_v32, 0.0 }
  0x23   :  { %208 = vst [vmem:[%s581_s3 + $0xd0] sm:$0xff] %v168_v5 }
  0x24   :  { %209 = vst [vmem:[%s581_s3 + $0xd8] sm:$0xff] %v169_v9 }
  0x25   :  { %210 = vst [vmem:[%s581_s3 + $0xe0] sm:$0xff] %v170_v13 }
  0x26   :  { %211 = vst [vmem:[%s581_s3 + $0xe8] sm:$0xff] %v171_v17 }
  0x27   :  { %212 = vst [vmem:[%s581_s3 + $0xf0] sm:$0xff] %v172_v20 }
  0x28   :  { %213 = vst [vmem:[%s581_s3 + $0xf8] sm:$0xff] %v173_v23 }
  0x29   :  { %214 = vst [vmem:[%s581_s3 + $0x100] sm:$0xff] %v174_v26 }
  0x2a   :  { %215 = vst [vmem:[%s581_s3 + $0x108] sm:$0xff] %v175_v28 }
  0x2b   :  { %216 = vst [vmem:[%s581_s3 + $0x110] sm:$0xff] %v176_v30 }
  0x2c   :  { %217 = vst [vmem:[%s581_s3 + $0x118] sm:$0xff] %v177_v31 }
  0x2d   :  { %218 = vst [vmem:[%s581_s3 + $0x120] sm:$0xff] %v178_v33 }
  0x2e   :  { %219 = vst [vmem:[%s581_s3 + $0x128] sm:$0xff] %v179_v34 }
  0x2f   :  { %220 = vst [vmem:[%s581_s3 + $0x130] sm:$0xff] %v180_v35 }
  0x30   :  { %221 = vst [vmem:[%s581_s3 + $0x138] sm:$0xff] %v181_v2 }

</bundles_post_ra>
